<compile_context>
chip_gen: v5e
topology: v5e:2x2
jax: 0.10.0
libtpu: 0.0.40
codegen_flags: <defaults>
</compile_context>

<pallas_src>
import jax
import jax.numpy as jnp
from jax.experimental import pallas as pl
from jax.experimental.pallas import tpu as pltpu

F_DIM   = 8     # mstcn_f_dim
LEN_Q   = 28    # len_q (28 -> conv/pool pipeline yields 128*4 = 512 = Linear(512, .) input)
OUT_F   = 4     # out_features
T_STEPS = 8     # time length of l -> batch of causal windows
K       = 5     # conv kernel size
BN_EPS  = 1e-5
C_PAD   = 128   # lane-dense channel padding
N_POS2  = 4     # pooled positions after stage 2 (fixed by LEN_Q=28 / Linear(512, 256))


def _r8(n):
    return ((n + 7) // 8) * 8


# ------------------------------ fused kernel -------------------------------

def make_fused_kernel(t_steps):
    n1 = t_steps + LEN_Q - K        # shared stage-1 conv rows      (31 for T=8)
    nm = n1 - 1                     # shared stage-1 pooled rows    (30)
    ng = nm - 2 * (K - 1)           # shared stage-2 conv rows      (22)
    nh = ng - 2                     # shared stage-2 pooled rows    (20)

    def kernel(x_ref, w1_ref, b1_ref, t1_ref, w2_ref, b2_ref, t2_ref,
               wl1_ref, bl1_ref, wl2_ref, bl2_ref, wl3_ref, bl3_ref,
               wl4_ref, bl4_ref, o_ref, rc1_ref, m_ref, rc2_ref, h_ref):
        f32 = jnp.float32

        # stage 1: Conv1d(F->64) as K shifted-slice matmuls, shared across windows.
        acc1 = jnp.zeros((n1, C_PAD), f32)
        for j in range(K):
            acc1 = acc1 + jnp.dot(x_ref[j:j + n1, :], w1_ref[j],
                                  preferred_element_type=f32)
        # bias + ReLU (BN1 scale already folded into w1/b1).
        rc1_ref[0:n1, :] = jnp.maximum(acc1 + b1_ref[...], 0.0)

        # MaxPool1d(2,2): pooled row q = max(conv rows q, q+1); then BN1 shift.
        m_ref[0:nm, :] = (jnp.maximum(rc1_ref[0:nm, :], rc1_ref[1:nm + 1, :])
                          + t1_ref[...])

        # stage 2: Conv1d(64->128) as K stride-2 shifted-slice matmuls.
        acc2 = jnp.zeros((ng, C_PAD), f32)
        for j in range(K):
            acc2 = acc2 + jnp.dot(m_ref[2 * j:2 * j + ng, :], w2_ref[j],
                                  preferred_element_type=f32)
        rc2_ref[0:ng, :] = jnp.maximum(acc2 + b2_ref[...], 0.0)

        # MaxPool1d(2,2): pooled row q = max(conv rows q, q+2); then BN2 shift.
        h_ref[0:nh, :] = (jnp.maximum(rc2_ref[0:nh, :], rc2_ref[2:nh + 2, :])
                          + t2_ref[...])

        # NCL flatten (channel-major) + linear1 fused: window i's feature (c, s)
        # is h[i + 4s, c], so linear1 = sum_s h[4s : 4s+T] @ wl1_s.
        z = jnp.zeros((t_steps, 256), f32)
        for s in range(N_POS2):
            z = z + jnp.dot(h_ref[4 * s:4 * s + t_steps, :], wl1_ref[s],
                            preferred_element_type=f32)
        z = jnp.maximum(z + bl1_ref[...], 0.0)

        # linear2 / linear3 (+ReLU), linear4 (no activation).
        z = jnp.maximum(jnp.dot(z, wl2_ref[...], preferred_element_type=f32)
                        + bl2_ref[...], 0.0)
        z = jnp.maximum(jnp.dot(z, wl3_ref[...], preferred_element_type=f32)
                        + bl3_ref[...], 0.0)
        o_ref[...] = (jnp.dot(z, wl4_ref[...], preferred_element_type=f32)
                      + bl4_ref[...])

    return kernel, (n1, nm, ng, nh)


def timeseries_net_forward(l, kp):
    t_steps = int(l.shape[2])
    f_dim = int(l.shape[1])
    kernel, (n1, nm, ng, nh) = make_fused_kernel(t_steps)
    x_rows = _r8(n1 + K - 1)

    # Zero-padded causal sequence (every window is a slice of it), channel-last,
    # lane-padded to 128.  Three tiny XLA ops; the heavy im2col glue is gone.
    seq = jnp.transpose(l[0], (1, 0)).astype(jnp.float32)            # (T, F)
    x = jnp.zeros((x_rows, C_PAD), jnp.float32)
    x = x.at[LEN_Q - 1:LEN_Q - 1 + t_steps, :f_dim].set(seq)

    return pl.pallas_call(
        kernel,
        out_shape=jax.ShapeDtypeStruct((t_steps, OUT_F), jnp.float32),
        in_specs=[pl.BlockSpec(memory_space=pltpu.MemorySpace.VMEM)] * 15,
        out_specs=pl.BlockSpec(memory_space=pltpu.MemorySpace.VMEM),
        scratch_shapes=[
            pltpu.VMEM((_r8(n1), C_PAD), jnp.float32),   # stage-1 conv + ReLU
            pltpu.VMEM((_r8(nm), C_PAD), jnp.float32),   # stage-1 pool + BN
            pltpu.VMEM((_r8(ng), C_PAD), jnp.float32),   # stage-2 conv + ReLU
            pltpu.VMEM((_r8(nh), C_PAD), jnp.float32),   # stage-2 pool + BN
        ],
    )(x, kp["w1"], kp["b1"], kp["t1"], kp["w2"], kp["b2"], kp["t2"],
      kp["wl1"], kp["bl1"], kp["wl2"], kp["bl2"], kp["wl3"], kp["bl3"],
      kp["wl4"], kp["bl4"])


# --------------------------- deterministic init ----------------------------

def init_params(key):
    """PyTorch-layout parameters. Biases / BN stats get small random values so the
    bias and BN paths are numerically exercised (forward semantics unchanged)."""
    ks = jax.random.split(key, 14)

    def kaiming_uniform(k, shape):          # torch Conv1d weight (Cout, Cin, K)
        fan_in = shape[1] * shape[2]
        bound = (6.0 / fan_in) ** 0.5
        return jax.random.uniform(k, shape, jnp.float32, -bound, bound)

    def xavier_normal(k, out_f, in_f):      # torch Linear weight (out, in)
        std = (2.0 / (in_f + out_f)) ** 0.5
        return std * jax.random.normal(k, (out_f, in_f), jnp.float32)

    def bn_stats(k, c):                     # eval-mode gamma/beta/running stats
        k1, k2, k3, k4 = jax.random.split(k, 4)
        gamma = jax.random.uniform(k1, (c,), jnp.float32, 0.5, 1.5)
        beta = 0.1 * jax.random.normal(k2, (c,), jnp.float32)
        mean = 0.1 * jax.random.normal(k3, (c,), jnp.float32)
        var = jax.random.uniform(k4, (c,), jnp.float32, 0.5, 1.5)
        return gamma, beta, mean, var

    return dict(
        w1=kaiming_uniform(ks[0], (64, F_DIM, K)),
        b1=0.1 * jax.random.normal(ks[1], (64,), jnp.float32),
        bn1=bn_stats(ks[2], 64),
        w2=kaiming_uniform(ks[3], (128, 64, K)),
        b2=0.1 * jax.random.normal(ks[4], (128,), jnp.float32),
        bn2=bn_stats(ks[5], 128),
        wl1=xavier_normal(ks[6], 256, 512),
        bl1=0.1 * jax.random.normal(ks[7], (256,), jnp.float32),
        wl2=xavier_normal(ks[8], 32, 256),
        bl2=0.1 * jax.random.normal(ks[9], (32,), jnp.float32),
        wl3=xavier_normal(ks[10], 16, 32),
        bl3=0.1 * jax.random.normal(ks[11], (16,), jnp.float32),
        wl4=xavier_normal(ks[12], OUT_F, 16),
        bl4=0.1 * jax.random.normal(ks[13], (OUT_F,), jnp.float32),
    )


def prepare_kernel_params(p):
    """Fold BN scale into conv weights/bias, zero-pad channels to 128 lanes, and
    restructure weights for the shared-conv / fused-flatten kernel."""
    def bn_scale_shift(bn):
        gamma, beta, mean, var = bn
        s = gamma / jnp.sqrt(var + BN_EPS)        # s > 0: commutes with ReLU/max-pool
        return s, beta - mean * s

    s1, t1 = bn_scale_shift(p["bn1"])
    s2, t2 = bn_scale_shift(p["bn2"])

    # Conv taps laid out (K, Cin_pad, Cout_pad) with BN scale folded in.
    w1 = jnp.transpose(p["w1"] * s1[:, None, None], (2, 1, 0))          # (K, F, 64)
    w1_taps = jnp.zeros((K, C_PAD, C_PAD), jnp.float32).at[:, :F_DIM, :64].set(w1)
    w2 = jnp.transpose(p["w2"] * s2[:, None, None], (2, 1, 0))          # (K, 64, 128)
    w2_taps = jnp.zeros((K, C_PAD, C_PAD), jnp.float32).at[:, :64, :].set(w2)

    def pad_row(v, width):
        return jnp.zeros((1, width), jnp.float32).at[0, :v.shape[0]].set(v)

    # linear1 re-sliced per pooled position s: NCL flatten index is c*4+s, so
    # wl1_s[c, n] = linear1.weight.T[c*4+s, n].
    wl1 = jnp.transpose(p["wl1"].T.reshape(C_PAD, N_POS2, 256), (1, 0, 2))  # (4,128,256)

    return dict(
        w1=w1_taps, b1=pad_row(p["b1"] * s1, C_PAD), t1=pad_row(t1, C_PAD),
        w2=w2_taps, b2=(p["b2"] * s2)[None, :], t2=t2[None, :],
        wl1=wl1, bl1=p["bl1"][None, :],
        wl2=p["wl2"].T, bl2=p["bl2"][None, :],
        wl3=p["wl3"].T, bl3=p["bl3"][None, :],
        wl4=p["wl4"].T, bl4=p["bl4"][None, :],
    )


# --------------------------- pure-JAX reference -----------------------------

def reference_forward(l, p):
    """Direct (per-window) re-implementation of TimeseriesNet.forward, eval mode."""
    seq = jnp.transpose(l[0], (1, 0))                                   # (T, F)
    t, f = seq.shape
    padded = jnp.concatenate([jnp.zeros((LEN_Q - 1, f), seq.dtype), seq], axis=0)
    windows = jnp.stack([padded[i:i + LEN_Q] for i in range(t)], axis=0)  # (T, len_q, F)

    def conv1d(x, w, b):            # x: (T, L, Cin) channel-last, w: (Cout, Cin, K)
        lout = x.shape[1] - w.shape[2] + 1
        taps = jnp.stack([x[:, j:j + lout, :] for j in range(w.shape[2])], axis=3)
        return jnp.einsum("tlck,ock->tlo", taps, w) + b

    def block(x, w, b, bn):
        gamma, beta, mean, var = bn
        h = jnp.maximum(conv1d(x, w, b), 0.0)
        tt, lout, c = h.shape
        h = h[:, :(lout // 2) * 2].reshape(tt, lout // 2, 2, c).max(axis=2)
        return (h - mean) / jnp.sqrt(var + BN_EPS) * gamma + beta

    h = block(windows, p["w1"], p["b1"], p["bn1"])
    h = block(h, p["w2"], p["b2"], p["bn2"])
    flat = jnp.transpose(h, (0, 2, 1)).reshape(t, -1)                   # NCL flatten
    z = jnp.maximum(flat @ p["wl1"].T + p["bl1"], 0.0)
    z = jnp.maximum(z @ p["wl2"].T + p["bl2"], 0.0)
    z = jnp.maximum(z @ p["wl3"].T + p["bl3"], 0.0)
    return z @ p["wl4"].T + p["bl4"]


if __name__ == "__main__":
    key = jax.random.PRNGKey(0)
    k_in, k_par = jax.random.split(key)
    l = jax.random.normal(k_in, (1, F_DIM, T_STEPS), jnp.float32)
    params = init_params(k_par)
    kparams = prepare_kernel_params(params)

    out = jax.jit(timeseries_net_forward)(l, kparams)
    out = jax.block_until_ready(out)

    ref = reference_forward(l, params)
    assert out.shape == (T_STEPS, OUT_F), out.shape
    if not jnp.allclose(out, ref, atol=1e-4, rtol=1e-4):
        raise AssertionError("Pallas output mismatches pure-JAX reference")
    print("KERNEL_OK")
</pallas_src>

<mosaic_0001>
module attributes {stable_mosaic.version = 11 : i64} {
  func.func @kernel(%arg0: memref<40x128xf32, #tpu.memory_space<vmem>>, %arg1: memref<5x128x128xf32, #tpu.memory_space<vmem>>, %arg2: memref<1x128xf32, #tpu.memory_space<vmem>>, %arg3: memref<1x128xf32, #tpu.memory_space<vmem>>, %arg4: memref<5x128x128xf32, #tpu.memory_space<vmem>>, %arg5: memref<1x128xf32, #tpu.memory_space<vmem>>, %arg6: memref<1x128xf32, #tpu.memory_space<vmem>>, %arg7: memref<4x128x256xf32, #tpu.memory_space<vmem>>, %arg8: memref<1x256xf32, #tpu.memory_space<vmem>>, %arg9: memref<256x32xf32, #tpu.memory_space<vmem>>, %arg10: memref<1x32xf32, #tpu.memory_space<vmem>>, %arg11: memref<32x16xf32, #tpu.memory_space<vmem>>, %arg12: memref<1x16xf32, #tpu.memory_space<vmem>>, %arg13: memref<16x4xf32, #tpu.memory_space<vmem>>, %arg14: memref<1x4xf32, #tpu.memory_space<vmem>>, %arg15: memref<8x4xf32, #tpu.memory_space<vmem>>, %arg16: memref<32x128xf32, #tpu.memory_space<vmem>>, %arg17: memref<32x128xf32, #tpu.memory_space<vmem>>, %arg18: memref<24x128xf32, #tpu.memory_space<vmem>>, %arg19: memref<24x128xf32, #tpu.memory_space<vmem>>) attributes {dimension_semantics = [], scalar_prefetch = 0 : i64, scratch_operands = 4 : i64, tpu.core_type = #tpu.core_type<tc>} {
    %cst = arith.constant 0.000000e+00 : f32
    %0 = vector.broadcast %cst : f32 to vector<31x128xf32>
    %c0 = arith.constant 0 : index
    %c0_0 = arith.constant 0 : index
    %1 = vector.load %arg0[%c0, %c0_0] : memref<40x128xf32, #tpu.memory_space<vmem>>, vector<31x128xf32>
    %c0_1 = arith.constant 0 : index
    %c0_2 = arith.constant 0 : index
    %c0_3 = arith.constant 0 : index
    %2 = vector.load %arg1[%c0_1, %c0_2, %c0_3] : memref<5x128x128xf32, #tpu.memory_space<vmem>>, vector<1x128x128xf32>
    %3 = vector.shape_cast %2 : vector<1x128x128xf32> to vector<128x128xf32>
    %cst_4 = arith.constant dense<0.000000e+00> : vector<31x128xf32>
    %4 = tpu.matmul %1, %3, %cst_4 {dimension_numbers = #tpu.dot_dimension_numbers<[1], [0], [0], [1], [0, 0, 1, 1], [], []>} : vector<31x128xf32>, vector<128x128xf32>, vector<31x128xf32> -> vector<31x128xf32>
    %5 = arith.addf %0, %4 : vector<31x128xf32>
    %c1 = arith.constant 1 : index
    %c0_5 = arith.constant 0 : index
    %6 = vector.load %arg0[%c1, %c0_5] : memref<40x128xf32, #tpu.memory_space<vmem>>, vector<31x128xf32>
    %c1_6 = arith.constant 1 : index
    %c0_7 = arith.constant 0 : index
    %c0_8 = arith.constant 0 : index
    %7 = vector.load %arg1[%c1_6, %c0_7, %c0_8] : memref<5x128x128xf32, #tpu.memory_space<vmem>>, vector<1x128x128xf32>
    %8 = vector.shape_cast %7 : vector<1x128x128xf32> to vector<128x128xf32>
    %cst_9 = arith.constant dense<0.000000e+00> : vector<31x128xf32>
    %9 = tpu.matmul %6, %8, %cst_9 {dimension_numbers = #tpu.dot_dimension_numbers<[1], [0], [0], [1], [0, 0, 1, 1], [], []>} : vector<31x128xf32>, vector<128x128xf32>, vector<31x128xf32> -> vector<31x128xf32>
    %10 = arith.addf %5, %9 : vector<31x128xf32>
    %c2 = arith.constant 2 : index
    %c0_10 = arith.constant 0 : index
    %11 = vector.load %arg0[%c2, %c0_10] : memref<40x128xf32, #tpu.memory_space<vmem>>, vector<31x128xf32>
    %c2_11 = arith.constant 2 : index
    %c0_12 = arith.constant 0 : index
    %c0_13 = arith.constant 0 : index
    %12 = vector.load %arg1[%c2_11, %c0_12, %c0_13] : memref<5x128x128xf32, #tpu.memory_space<vmem>>, vector<1x128x128xf32>
    %13 = vector.shape_cast %12 : vector<1x128x128xf32> to vector<128x128xf32>
    %cst_14 = arith.constant dense<0.000000e+00> : vector<31x128xf32>
    %14 = tpu.matmul %11, %13, %cst_14 {dimension_numbers = #tpu.dot_dimension_numbers<[1], [0], [0], [1], [0, 0, 1, 1], [], []>} : vector<31x128xf32>, vector<128x128xf32>, vector<31x128xf32> -> vector<31x128xf32>
    %15 = arith.addf %10, %14 : vector<31x128xf32>
    %c3 = arith.constant 3 : index
    %c0_15 = arith.constant 0 : index
    %16 = vector.load %arg0[%c3, %c0_15] : memref<40x128xf32, #tpu.memory_space<vmem>>, vector<31x128xf32>
    %c3_16 = arith.constant 3 : index
    %c0_17 = arith.constant 0 : index
    %c0_18 = arith.constant 0 : index
    %17 = vector.load %arg1[%c3_16, %c0_17, %c0_18] : memref<5x128x128xf32, #tpu.memory_space<vmem>>, vector<1x128x128xf32>
    %18 = vector.shape_cast %17 : vector<1x128x128xf32> to vector<128x128xf32>
    %cst_19 = arith.constant dense<0.000000e+00> : vector<31x128xf32>
    %19 = tpu.matmul %16, %18, %cst_19 {dimension_numbers = #tpu.dot_dimension_numbers<[1], [0], [0], [1], [0, 0, 1, 1], [], []>} : vector<31x128xf32>, vector<128x128xf32>, vector<31x128xf32> -> vector<31x128xf32>
    %20 = arith.addf %15, %19 : vector<31x128xf32>
    %c4 = arith.constant 4 : index
    %c0_20 = arith.constant 0 : index
    %21 = vector.load %arg0[%c4, %c0_20] : memref<40x128xf32, #tpu.memory_space<vmem>>, vector<31x128xf32>
    %c4_21 = arith.constant 4 : index
    %c0_22 = arith.constant 0 : index
    %c0_23 = arith.constant 0 : index
    %22 = vector.load %arg1[%c4_21, %c0_22, %c0_23] : memref<5x128x128xf32, #tpu.memory_space<vmem>>, vector<1x128x128xf32>
    %23 = vector.shape_cast %22 : vector<1x128x128xf32> to vector<128x128xf32>
    %cst_24 = arith.constant dense<0.000000e+00> : vector<31x128xf32>
    %24 = tpu.matmul %21, %23, %cst_24 {dimension_numbers = #tpu.dot_dimension_numbers<[1], [0], [0], [1], [0, 0, 1, 1], [], []>} : vector<31x128xf32>, vector<128x128xf32>, vector<31x128xf32> -> vector<31x128xf32>
    %25 = arith.addf %20, %24 : vector<31x128xf32>
    %c0_25 = arith.constant 0 : index
    %c0_26 = arith.constant 0 : index
    %26 = vector.load %arg2[%c0_25, %c0_26] : memref<1x128xf32, #tpu.memory_space<vmem>>, vector<1x128xf32>
    %27 = vector.broadcast %26 : vector<1x128xf32> to vector<31x128xf32>
    %28 = arith.addf %25, %27 : vector<31x128xf32>
    %cst_27 = arith.constant 0.000000e+00 : f32
    %29 = vector.broadcast %cst_27 : f32 to vector<31x128xf32>
    %30 = arith.maximumf %28, %29 : vector<31x128xf32>
    %c0_28 = arith.constant 0 : index
    %c0_29 = arith.constant 0 : index
    %31 = vector.load %arg16[%c0_28, %c0_29] : memref<32x128xf32, #tpu.memory_space<vmem>>, vector<31x128xf32>
    tpu.vector_store %arg16[%c0_28, %c0_29], %30 {strides = array<i32>} : memref<32x128xf32, #tpu.memory_space<vmem>>, vector<31x128xf32>,
    %c0_30 = arith.constant 0 : index
    %c0_31 = arith.constant 0 : index
    %32 = vector.load %arg16[%c0_30, %c0_31] : memref<32x128xf32, #tpu.memory_space<vmem>>, vector<30x128xf32>
    %c1_32 = arith.constant 1 : index
    %c0_33 = arith.constant 0 : index
    %33 = vector.load %arg16[%c1_32, %c0_33] : memref<32x128xf32, #tpu.memory_space<vmem>>, vector<30x128xf32>
    %34 = arith.maximumf %32, %33 : vector<30x128xf32>
    %c0_34 = arith.constant 0 : index
    %c0_35 = arith.constant 0 : index
    %35 = vector.load %arg3[%c0_34, %c0_35] : memref<1x128xf32, #tpu.memory_space<vmem>>, vector<1x128xf32>
    %36 = vector.broadcast %35 : vector<1x128xf32> to vector<30x128xf32>
    %37 = arith.addf %34, %36 : vector<30x128xf32>
    %c0_36 = arith.constant 0 : index
    %c0_37 = arith.constant 0 : index
    %38 = vector.load %arg17[%c0_36, %c0_37] : memref<32x128xf32, #tpu.memory_space<vmem>>, vector<30x128xf32>
    tpu.vector_store %arg17[%c0_36, %c0_37], %37 {strides = array<i32>} : memref<32x128xf32, #tpu.memory_space<vmem>>, vector<30x128xf32>,
    %cst_38 = arith.constant 0.000000e+00 : f32
    %39 = vector.broadcast %cst_38 : f32 to vector<22x128xf32>
    %c0_39 = arith.constant 0 : index
    %c0_40 = arith.constant 0 : index
    %40 = vector.load %arg17[%c0_39, %c0_40] : memref<32x128xf32, #tpu.memory_space<vmem>>, vector<22x128xf32>
    %c0_41 = arith.constant 0 : index
    %c0_42 = arith.constant 0 : index
    %c0_43 = arith.constant 0 : index
    %41 = vector.load %arg4[%c0_41, %c0_42, %c0_43] : memref<5x128x128xf32, #tpu.memory_space<vmem>>, vector<1x128x128xf32>
    %42 = vector.shape_cast %41 : vector<1x128x128xf32> to vector<128x128xf32>
    %cst_44 = arith.constant dense<0.000000e+00> : vector<22x128xf32>
    %43 = tpu.matmul %40, %42, %cst_44 {dimension_numbers = #tpu.dot_dimension_numbers<[1], [0], [0], [1], [0, 0, 1, 1], [], []>} : vector<22x128xf32>, vector<128x128xf32>, vector<22x128xf32> -> vector<22x128xf32>
    %44 = arith.addf %39, %43 : vector<22x128xf32>
    %c2_45 = arith.constant 2 : index
    %c0_46 = arith.constant 0 : index
    %45 = vector.load %arg17[%c2_45, %c0_46] : memref<32x128xf32, #tpu.memory_space<vmem>>, vector<22x128xf32>
    %c1_47 = arith.constant 1 : index
    %c0_48 = arith.constant 0 : index
    %c0_49 = arith.constant 0 : index
    %46 = vector.load %arg4[%c1_47, %c0_48, %c0_49] : memref<5x128x128xf32, #tpu.memory_space<vmem>>, vector<1x128x128xf32>
    %47 = vector.shape_cast %46 : vector<1x128x128xf32> to vector<128x128xf32>
    %cst_50 = arith.constant dense<0.000000e+00> : vector<22x128xf32>
    %48 = tpu.matmul %45, %47, %cst_50 {dimension_numbers = #tpu.dot_dimension_numbers<[1], [0], [0], [1], [0, 0, 1, 1], [], []>} : vector<22x128xf32>, vector<128x128xf32>, vector<22x128xf32> -> vector<22x128xf32>
    %49 = arith.addf %44, %48 : vector<22x128xf32>
    %c4_51 = arith.constant 4 : index
    %c0_52 = arith.constant 0 : index
    %50 = vector.load %arg17[%c4_51, %c0_52] : memref<32x128xf32, #tpu.memory_space<vmem>>, vector<22x128xf32>
    %c2_53 = arith.constant 2 : index
    %c0_54 = arith.constant 0 : index
    %c0_55 = arith.constant 0 : index
    %51 = vector.load %arg4[%c2_53, %c0_54, %c0_55] : memref<5x128x128xf32, #tpu.memory_space<vmem>>, vector<1x128x128xf32>
    %52 = vector.shape_cast %51 : vector<1x128x128xf32> to vector<128x128xf32>
    %cst_56 = arith.constant dense<0.000000e+00> : vector<22x128xf32>
    %53 = tpu.matmul %50, %52, %cst_56 {dimension_numbers = #tpu.dot_dimension_numbers<[1], [0], [0], [1], [0, 0, 1, 1], [], []>} : vector<22x128xf32>, vector<128x128xf32>, vector<22x128xf32> -> vector<22x128xf32>
    %54 = arith.addf %49, %53 : vector<22x128xf32>
    %c6 = arith.constant 6 : index
    %c0_57 = arith.constant 0 : index
    %55 = vector.load %arg17[%c6, %c0_57] : memref<32x128xf32, #tpu.memory_space<vmem>>, vector<22x128xf32>
    %c3_58 = arith.constant 3 : index
    %c0_59 = arith.constant 0 : index
    %c0_60 = arith.constant 0 : index
    %56 = vector.load %arg4[%c3_58, %c0_59, %c0_60] : memref<5x128x128xf32, #tpu.memory_space<vmem>>, vector<1x128x128xf32>
    %57 = vector.shape_cast %56 : vector<1x128x128xf32> to vector<128x128xf32>
    %cst_61 = arith.constant dense<0.000000e+00> : vector<22x128xf32>
    %58 = tpu.matmul %55, %57, %cst_61 {dimension_numbers = #tpu.dot_dimension_numbers<[1], [0], [0], [1], [0, 0, 1, 1], [], []>} : vector<22x128xf32>, vector<128x128xf32>, vector<22x128xf32> -> vector<22x128xf32>
    %59 = arith.addf %54, %58 : vector<22x128xf32>
    %c8 = arith.constant 8 : index
    %c0_62 = arith.constant 0 : index
    %60 = vector.load %arg17[%c8, %c0_62] : memref<32x128xf32, #tpu.memory_space<vmem>>, vector<22x128xf32>
    %c4_63 = arith.constant 4 : index
    %c0_64 = arith.constant 0 : index
    %c0_65 = arith.constant 0 : index
    %61 = vector.load %arg4[%c4_63, %c0_64, %c0_65] : memref<5x128x128xf32, #tpu.memory_space<vmem>>, vector<1x128x128xf32>
    %62 = vector.shape_cast %61 : vector<1x128x128xf32> to vector<128x128xf32>
    %cst_66 = arith.constant dense<0.000000e+00> : vector<22x128xf32>
    %63 = tpu.matmul %60, %62, %cst_66 {dimension_numbers = #tpu.dot_dimension_numbers<[1], [0], [0], [1], [0, 0, 1, 1], [], []>} : vector<22x128xf32>, vector<128x128xf32>, vector<22x128xf32> -> vector<22x128xf32>
    %64 = arith.addf %59, %63 : vector<22x128xf32>
    %c0_67 = arith.constant 0 : index
    %c0_68 = arith.constant 0 : index
    %65 = vector.load %arg5[%c0_67, %c0_68] : memref<1x128xf32, #tpu.memory_space<vmem>>, vector<1x128xf32>
    %66 = vector.broadcast %65 : vector<1x128xf32> to vector<22x128xf32>
    %67 = arith.addf %64, %66 : vector<22x128xf32>
    %cst_69 = arith.constant 0.000000e+00 : f32
    %68 = vector.broadcast %cst_69 : f32 to vector<22x128xf32>
    %69 = arith.maximumf %67, %68 : vector<22x128xf32>
    %c0_70 = arith.constant 0 : index
    %c0_71 = arith.constant 0 : index
    %70 = vector.load %arg18[%c0_70, %c0_71] : memref<24x128xf32, #tpu.memory_space<vmem>>, vector<22x128xf32>
    tpu.vector_store %arg18[%c0_70, %c0_71], %69 {strides = array<i32>} : memref<24x128xf32, #tpu.memory_space<vmem>>, vector<22x128xf32>,
    %c0_72 = arith.constant 0 : index
    %c0_73 = arith.constant 0 : index
    %71 = vector.load %arg18[%c0_72, %c0_73] : memref<24x128xf32, #tpu.memory_space<vmem>>, vector<20x128xf32>
    %c2_74 = arith.constant 2 : index
    %c0_75 = arith.constant 0 : index
    %72 = vector.load %arg18[%c2_74, %c0_75] : memref<24x128xf32, #tpu.memory_space<vmem>>, vector<20x128xf32>
    %73 = arith.maximumf %71, %72 : vector<20x128xf32>
    %c0_76 = arith.constant 0 : index
    %c0_77 = arith.constant 0 : index
    %74 = vector.load %arg6[%c0_76, %c0_77] : memref<1x128xf32, #tpu.memory_space<vmem>>, vector<1x128xf32>
    %75 = vector.broadcast %74 : vector<1x128xf32> to vector<20x128xf32>
    %76 = arith.addf %73, %75 : vector<20x128xf32>
    %c0_78 = arith.constant 0 : index
    %c0_79 = arith.constant 0 : index
    %77 = vector.load %arg19[%c0_78, %c0_79] : memref<24x128xf32, #tpu.memory_space<vmem>>, vector<20x128xf32>
    tpu.vector_store %arg19[%c0_78, %c0_79], %76 {strides = array<i32>} : memref<24x128xf32, #tpu.memory_space<vmem>>, vector<20x128xf32>,
    %cst_80 = arith.constant 0.000000e+00 : f32
    %78 = vector.broadcast %cst_80 : f32 to vector<8x256xf32>
    %c0_81 = arith.constant 0 : index
    %c0_82 = arith.constant 0 : index
    %79 = vector.load %arg19[%c0_81, %c0_82] : memref<24x128xf32, #tpu.memory_space<vmem>>, vector<8x128xf32>
    %c0_83 = arith.constant 0 : index
    %c0_84 = arith.constant 0 : index
    %c0_85 = arith.constant 0 : index
    %80 = vector.load %arg7[%c0_83, %c0_84, %c0_85] : memref<4x128x256xf32, #tpu.memory_space<vmem>>, vector<1x128x256xf32>
    %81 = vector.shape_cast %80 : vector<1x128x256xf32> to vector<128x256xf32>
    %cst_86 = arith.constant dense<0.000000e+00> : vector<8x256xf32>
    %82 = tpu.matmul %79, %81, %cst_86 {dimension_numbers = #tpu.dot_dimension_numbers<[1], [0], [0], [1], [0, 0, 1, 1], [], []>} : vector<8x128xf32>, vector<128x256xf32>, vector<8x256xf32> -> vector<8x256xf32>
    %83 = arith.addf %78, %82 : vector<8x256xf32>
    %c4_87 = arith.constant 4 : index
    %c0_88 = arith.constant 0 : index
    %84 = vector.load %arg19[%c4_87, %c0_88] : memref<24x128xf32, #tpu.memory_space<vmem>>, vector<8x128xf32>
    %c1_89 = arith.constant 1 : index
    %c0_90 = arith.constant 0 : index
    %c0_91 = arith.constant 0 : index
    %85 = vector.load %arg7[%c1_89, %c0_90, %c0_91] : memref<4x128x256xf32, #tpu.memory_space<vmem>>, vector<1x128x256xf32>
    %86 = vector.shape_cast %85 : vector<1x128x256xf32> to vector<128x256xf32>
    %cst_92 = arith.constant dense<0.000000e+00> : vector<8x256xf32>
    %87 = tpu.matmul %84, %86, %cst_92 {dimension_numbers = #tpu.dot_dimension_numbers<[1], [0], [0], [1], [0, 0, 1, 1], [], []>} : vector<8x128xf32>, vector<128x256xf32>, vector<8x256xf32> -> vector<8x256xf32>
    %88 = arith.addf %83, %87 : vector<8x256xf32>
    %c8_93 = arith.constant 8 : index
    %c0_94 = arith.constant 0 : index
    %89 = vector.load %arg19[%c8_93, %c0_94] : memref<24x128xf32, #tpu.memory_space<vmem>>, vector<8x128xf32>
    %c2_95 = arith.constant 2 : index
    %c0_96 = arith.constant 0 : index
    %c0_97 = arith.constant 0 : index
    %90 = vector.load %arg7[%c2_95, %c0_96, %c0_97] : memref<4x128x256xf32, #tpu.memory_space<vmem>>, vector<1x128x256xf32>
    %91 = vector.shape_cast %90 : vector<1x128x256xf32> to vector<128x256xf32>
    %cst_98 = arith.constant dense<0.000000e+00> : vector<8x256xf32>
    %92 = tpu.matmul %89, %91, %cst_98 {dimension_numbers = #tpu.dot_dimension_numbers<[1], [0], [0], [1], [0, 0, 1, 1], [], []>} : vector<8x128xf32>, vector<128x256xf32>, vector<8x256xf32> -> vector<8x256xf32>
    %93 = arith.addf %88, %92 : vector<8x256xf32>
    %c12 = arith.constant 12 : index
    %c0_99 = arith.constant 0 : index
    %94 = vector.load %arg19[%c12, %c0_99] : memref<24x128xf32, #tpu.memory_space<vmem>>, vector<8x128xf32>
    %c3_100 = arith.constant 3 : index
    %c0_101 = arith.constant 0 : index
    %c0_102 = arith.constant 0 : index
    %95 = vector.load %arg7[%c3_100, %c0_101, %c0_102] : memref<4x128x256xf32, #tpu.memory_space<vmem>>, vector<1x128x256xf32>
    %96 = vector.shape_cast %95 : vector<1x128x256xf32> to vector<128x256xf32>
    %cst_103 = arith.constant dense<0.000000e+00> : vector<8x256xf32>
    %97 = tpu.matmul %94, %96, %cst_103 {dimension_numbers = #tpu.dot_dimension_numbers<[1], [0], [0], [1], [0, 0, 1, 1], [], []>} : vector<8x128xf32>, vector<128x256xf32>, vector<8x256xf32> -> vector<8x256xf32>
    %98 = arith.addf %93, %97 : vector<8x256xf32>
    %c0_104 = arith.constant 0 : index
    %c0_105 = arith.constant 0 : index
    %99 = vector.load %arg8[%c0_104, %c0_105] : memref<1x256xf32, #tpu.memory_space<vmem>>, vector<1x256xf32>
    %100 = vector.broadcast %99 : vector<1x256xf32> to vector<8x256xf32>
    %101 = arith.addf %98, %100 : vector<8x256xf32>
    %cst_106 = arith.constant 0.000000e+00 : f32
    %102 = vector.broadcast %cst_106 : f32 to vector<8x256xf32>
    %103 = arith.maximumf %101, %102 : vector<8x256xf32>
    %c0_107 = arith.constant 0 : index
    %c0_108 = arith.constant 0 : index
    %104 = vector.load %arg9[%c0_107, %c0_108] : memref<256x32xf32, #tpu.memory_space<vmem>>, vector<256x32xf32>
    %cst_109 = arith.constant dense<0.000000e+00> : vector<8x32xf32>
    %105 = tpu.matmul %103, %104, %cst_109 {dimension_numbers = #tpu.dot_dimension_numbers<[1], [0], [0], [1], [0, 0, 1, 1], [], []>} : vector<8x256xf32>, vector<256x32xf32>, vector<8x32xf32> -> vector<8x32xf32>
    %c0_110 = arith.constant 0 : index
    %c0_111 = arith.constant 0 : index
    %106 = vector.load %arg10[%c0_110, %c0_111] : memref<1x32xf32, #tpu.memory_space<vmem>>, vector<1x32xf32>
    %107 = vector.broadcast %106 : vector<1x32xf32> to vector<8x32xf32>
    %108 = arith.addf %105, %107 : vector<8x32xf32>
    %cst_112 = arith.constant 0.000000e+00 : f32
    %109 = vector.broadcast %cst_112 : f32 to vector<8x32xf32>
    %110 = arith.maximumf %108, %109 : vector<8x32xf32>
    %c0_113 = arith.constant 0 : index
    %c0_114 = arith.constant 0 : index
    %111 = vector.load %arg11[%c0_113, %c0_114] : memref<32x16xf32, #tpu.memory_space<vmem>>, vector<32x16xf32>
    %cst_115 = arith.constant dense<0.000000e+00> : vector<8x16xf32>
    %112 = tpu.matmul %110, %111, %cst_115 {dimension_numbers = #tpu.dot_dimension_numbers<[1], [0], [0], [1], [0, 0, 1, 1], [], []>} : vector<8x32xf32>, vector<32x16xf32>, vector<8x16xf32> -> vector<8x16xf32>
    %c0_116 = arith.constant 0 : index
    %c0_117 = arith.constant 0 : index
    %113 = vector.load %arg12[%c0_116, %c0_117] : memref<1x16xf32, #tpu.memory_space<vmem>>, vector<1x16xf32>
    %114 = vector.broadcast %113 : vector<1x16xf32> to vector<8x16xf32>
    %115 = arith.addf %112, %114 : vector<8x16xf32>
    %cst_118 = arith.constant 0.000000e+00 : f32
    %116 = vector.broadcast %cst_118 : f32 to vector<8x16xf32>
    %117 = arith.maximumf %115, %116 : vector<8x16xf32>
    %c0_119 = arith.constant 0 : index
    %c0_120 = arith.constant 0 : index
    %118 = vector.load %arg13[%c0_119, %c0_120] : memref<16x4xf32, #tpu.memory_space<vmem>>, vector<16x4xf32>
    %cst_121 = arith.constant dense<0.000000e+00> : vector<8x4xf32>
    %119 = tpu.matmul %117, %118, %cst_121 {dimension_numbers = #tpu.dot_dimension_numbers<[1], [0], [0], [1], [0, 0, 1, 1], [], []>} : vector<8x16xf32>, vector<16x4xf32>, vector<8x4xf32> -> vector<8x4xf32>
    %c0_122 = arith.constant 0 : index
    %c0_123 = arith.constant 0 : index
    %120 = vector.load %arg14[%c0_122, %c0_123] : memref<1x4xf32, #tpu.memory_space<vmem>>, vector<1x4xf32>
    %121 = vector.broadcast %120 : vector<1x4xf32> to vector<8x4xf32>
    %122 = arith.addf %119, %121 : vector<8x4xf32>
    %c0_124 = arith.constant 0 : index
    %c0_125 = arith.constant 0 : index
    %123 = vector.load %arg15[%c0_124, %c0_125] : memref<8x4xf32, #tpu.memory_space<vmem>>, vector<8x4xf32>
    tpu.vector_store %arg15[%c0_124, %c0_125], %122 {strides = array<i32>} : memref<8x4xf32, #tpu.memory_space<vmem>>, vector<8x4xf32>,
    return
  }
}

</mosaic_0001>

<bundles_post_ra>
// kernel: timeseries_net_forward.1
= control target key start
LH: loop header
LB: loop body
LE: loop exit
PB: predicated region body
PF: predicated region fallthrough
CT: control target
= control target key end

     0   :  { %20 = vsyncpa [#allocation7], 0  ;;  %s1556_s0 = inlined_call_operand.vmem [shape: f32[40,128], index: 0, kind: input, shape index: {}]   ;;  %s1557_s1 = inlined_call_operand.hbm [shape: f32[5,128,128], index: 1, kind: input, shape index: {}]   ;;  %s1558_s2 = inlined_call_operand.vmem [shape: f32[1,128], index: 2, kind: input, shape index: {}]   ;;  %s1559_s3 = inlined_call_operand.vmem [shape: f32[1,128], index: 3, kind: input, shape index: {}]   ;;  %s1560_s4 = inlined_call_operand.hbm [shape: f32[5,128,128], index: 4, kind: input, shape index: {}]   ;;  %s1561_s5 = inlined_call_operand.vmem [shape: f32[1,128], index: 5, kind: input, shape index: {}]   ;;  %s1562_s6 = inlined_call_operand.vmem [shape: f32[1,128], index: 6, kind: input, shape index: {}]   ;;  %s1563_s7 = inlined_call_operand.hbm [shape: f32[4,128,256], index: 7, kind: input, shape index: {}]   ;;  %s1564_s8 = inlined_call_operand.vmem [shape: f32[1,256], index: 8, kind: input, shape index: {}]   ;;  %s1565_s9 = inlined_call_operand.vmem [shape: f32[256,32], index: 9, kind: input, shape index: {}]   ;;  %s1566_s10 = inlined_call_operand.vmem [shape: f32[1,32], index: 10, kind: input, shape index: {}]   ;;  %s1567_s11 = inlined_call_operand.vmem [shape: f32[32,16], index: 11, kind: input, shape index: {}]   ;;  %s1568_s12 = inlined_call_operand.vmem [shape: f32[1,16], index: 12, kind: input, shape index: {}]   ;;  %s1569_s13 = inlined_call_operand.vmem [shape: f32[16,4], index: 13, kind: input, shape index: {}]   ;;  %s1570_s14 = inlined_call_operand.vmem [shape: f32[1,4], index: 14, kind: input, shape index: {}]   ;;  %s1571_s15 = inlined_call_operand.vmem [shape: f32[8,4], index: 15, kind: output, shape index: {}]  }
   0x1   :  { %21 = vsyncpa [#allocation9], 0  ;;  %s45_s20 = sshll.u32 %s1560_s4, 4  ;;  %s1217_s21 = smov [#allocation8]   ;;  %s46_s20 = int_to_ptr.hbm [resolvable:$true] %s45_s20 }
   0x2   :  { %s47_s22 = sshll.u32 %s1217_s21, 4  ;;  %s28_s25 = sshll.u32 %s1557_s1, 4  ;;  %s48_s22 = int_to_ptr.vmem [resolvable:$true] %s47_s22  ;;  %s29_s25 = int_to_ptr.hbm [resolvable:$true] %s28_s25 }
   0x3   :  { %s1218_s26 = smov 128   ;;  %s1219_s27 = smov 8  }
   0x4   :  { %53 = dma.hbm_to_vmem [thread:$0]  %s46_s20, 10240, %s48_s22, [#allocation9], %s1218_s26, %s1218_s26, %s1219_s27  }
   0x5   :  { %s1220_s28 = smov [#allocation6]   ;;  %s62_s17 = sshll.u32 %s1563_s7, 4  ;;  %s63_s17 = int_to_ptr.hbm [resolvable:$true] %s62_s17 }
   0x6   :  { %s30_s29 = sshll.u32 %s1220_s28, 4  ;;  %s1221_s4 = smov [#allocation10]   ;;  %s31_s29 = int_to_ptr.vmem [resolvable:$true] %s30_s29 }
   0x7   :  { %36 = dma.hbm_to_vmem [thread:$0]  %s29_s25, 10240, %s31_s29, [#allocation7], %s1218_s26, %s1218_s26, %s1219_s27  }
   0x8   :  { %s64_s18 = sshll.u32 %s1221_s4, 4  ;;  %s1222_s19 = smov 256   ;;  %s65_s18 = int_to_ptr.vmem [resolvable:$true] %s64_s18 }
   0x9   :  { %s1223_s21 = smov 16  }
   0xa   :  { %70 = dma.hbm_to_vmem [thread:$0]  %s63_s17, 16384, %s65_s18, [#allocation9], %s1222_s19, %s1222_s19, %s1223_s21  }
   0xb   :  { %1213 = dma.done.wait [#allocation7], 10240  }
   0xc   :  { %1214 = vsyncadd [#allocation7], 4294957056 }
   0xd   :  { %1215 = dma.done.wait [#allocation9], 26624  }
   0xe   :  { %1216 = vsyncadd [#allocation9], 4294940672  ;;  %v137_v0 = vld [vmem:[#allocation6 + $0xf8] sm:$0xff]  ;;  %v136_v3 = vld [vmem:[#allocation6 + $0xf0] sm:$0xff]  ;;  %vm1062_vm0 = vcmask 261120   ;;  %vm1093_vm1 = vcmask 130048  }
   0xf   :  { %v116_v1 = vld [vmem:[#allocation6 + $0x78] sm:$0xff]  ;;  %138 = vmatpush.msra.mxu0 %v137_v0  ;;  %v115_v4 = vld [vmem:[#allocation6 + $0x70] sm:$0xff]  ;;  %v135_v7 = vld [vmem:[#allocation6 + $0xe8] sm:$0xff]  ;;  %vm1117_vm2 = vcmask 31744  }
  0x10   :  { %v216_v2 = vld [vmem:[#allocation6 + $0x178] sm:$0xff]  ;;  %167 = vmatpush.msra.mxu1 %v116_v1  ;;  %v215_v5 = vld [vmem:[#allocation6 + $0x170] sm:$0xff]  ;;  %v114_v8 = vld [vmem:[#allocation6 + $0x68] sm:$0xff] }
  0x11   :  { %217 = vmatpush.msra.mxu2 %v216_v2  ;;  %v270_v6 = vld [vmem:[#allocation6 + $0x1f8] sm:$0xff]  ;;  %139 = vmatpush.msra.mxu0 %v136_v3  ;;  %v214_v9 = vld [vmem:[#allocation6 + $0x168] sm:$0xff]  ;;  %v269_v10 = vld [vmem:[#allocation6 + $0x1f0] sm:$0xff] }
  0x12   :  { %168 = vmatpush.msra.mxu1 %v115_v4  ;;  %271 = vmatpush.msra.mxu3 %v270_v6  ;;  %v134_v11 = vld [vmem:[#allocation6 + $0xe0] sm:$0xff]  ;;  %v268_v14 = vld [vmem:[#allocation6 + $0x1e8] sm:$0xff]  ;;  %v133_v15 = vld [vmem:[#allocation6 + $0xd8] sm:$0xff] }
  0x13   :  { %218 = vmatpush.msra.mxu2 %v215_v5  ;;  %v113_v12 = vld [vmem:[#allocation6 + $0x60] sm:$0xff]  ;;  %140 = vmatpush.msra.mxu0 %v135_v7  ;;  %v112_v16 = vld [vmem:[#allocation6 + $0x58] sm:$0xff]  ;;  %v132_v19 = vld [vmem:[#allocation6 + $0xd0] sm:$0xff] }
  0x14   :  { %169 = vmatpush.msra.mxu1 %v114_v8  ;;  %v213_v13 = vld [vmem:[#allocation6 + $0x160] sm:$0xff]  ;;  %272 = vmatpush.msra.mxu3 %v269_v10  ;;  %v212_v17 = vld [vmem:[#allocation6 + $0x158] sm:$0xff]  ;;  %v111_v20 = vld [vmem:[#allocation6 + $0x50] sm:$0xff] }
  0x15   :  { %219 = vmatpush.msra.mxu2 %v214_v9  ;;  %141 = vmatpush.msra.mxu0 %v134_v11  ;;  %v267_v18 = vld [vmem:[#allocation6 + $0x1e0] sm:$0xff]  ;;  %v211_v21 = vld [vmem:[#allocation6 + $0x150] sm:$0xff]  ;;  %v266_v22 = vld [vmem:[#allocation6 + $0x1d8] sm:$0xff] }
  0x16   :  { %170 = vmatpush.msra.mxu1 %v113_v12  ;;  %273 = vmatpush.msra.mxu3 %v268_v14  ;;  %v131_v23 = vld [vmem:[#allocation6 + $0xc8] sm:$0xff]  ;;  %v265_v26 = vld [vmem:[#allocation6 + $0x1d0] sm:$0xff]  ;;  %v130_v27 = vld [vmem:[#allocation6 + $0xc0] sm:$0xff] }
  0x17   :  { %220 = vmatpush.msra.mxu2 %v213_v13  ;;  %142 = vmatpush.msra.mxu0 %v133_v15  ;;  %v110_v24 = vld [vmem:[#allocation6 + $0x48] sm:$0xff]  ;;  %v109_v28 = vld [vmem:[#allocation6 + $0x40] sm:$0xff]  ;;  %v129_v31 = vld [vmem:[#allocation6 + $0xb8] sm:$0xff] }
  0x18   :  { %171 = vmatpush.msra.mxu1 %v112_v16  ;;  %274 = vmatpush.msra.mxu3 %v267_v18  ;;  %v210_v25 = vld [vmem:[#allocation6 + $0x148] sm:$0xff]  ;;  %v209_v29 = vld [vmem:[#allocation6 + $0x140] sm:$0xff]  ;;  %v108_v32 = vld [vmem:[#allocation6 + $0x38] sm:$0xff] }
  0x19   :  { %221 = vmatpush.msra.mxu2 %v212_v17  ;;  %143 = vmatpush.msra.mxu0 %v132_v19  ;;  %v264_v30 = vld [vmem:[#allocation6 + $0x1c8] sm:$0xff]  ;;  %v208_v33 = vld [vmem:[#allocation6 + $0x138] sm:$0xff]  ;;  %v263_v34 = vld [vmem:[#allocation6 + $0x1c0] sm:$0xff] }
  0x1a   :  { %172 = vmatpush.msra.mxu1 %v111_v20  ;;  %275 = vmatpush.msra.mxu3 %v266_v22  ;;  %v128_v35 = vld [vmem:[#allocation6 + $0xb0] sm:$0xff]  ;;  %v262_v38 = vld [vmem:[#allocation6 + $0x1b8] sm:$0xff]  ;;  %v127_v39 = vld [vmem:[#allocation6 + $0xa8] sm:$0xff] }
  0x1b   :  { %222 = vmatpush.msra.mxu2 %v211_v21  ;;  %144 = vmatpush.msra.mxu0 %v131_v23  ;;  %v107_v36 = vld [vmem:[#allocation6 + $0x30] sm:$0xff]  ;;  %v106_v40 = vld [vmem:[#allocation6 + $0x28] sm:$0xff]  ;;  %v126_v43 = vld [vmem:[#allocation6 + $0xa0] sm:$0xff] }
  0x1c   :  { %173 = vmatpush.msra.mxu1 %v110_v24  ;;  %276 = vmatpush.msra.mxu3 %v265_v26  ;;  %v207_v37 = vld [vmem:[#allocation6 + $0x130] sm:$0xff]  ;;  %v206_v41 = vld [vmem:[#allocation6 + $0x128] sm:$0xff]  ;;  %v105_v44 = vld [vmem:[#allocation6 + $0x20] sm:$0xff] }
  0x1d   :  { %223 = vmatpush.msra.mxu2 %v210_v25  ;;  %145 = vmatpush.msra.mxu0 %v130_v27  ;;  %v261_v42 = vld [vmem:[#allocation6 + $0x1b0] sm:$0xff]  ;;  %v205_v45 = vld [vmem:[#allocation6 + $0x120] sm:$0xff]  ;;  %v260_v46 = vld [vmem:[#allocation6 + $0x1a8] sm:$0xff] }
  0x1e   :  { %174 = vmatpush.msra.mxu1 %v109_v28  ;;  %277 = vmatpush.msra.mxu3 %v264_v30  ;;  %v125_v47 = vld [vmem:[#allocation6 + $0x98] sm:$0xff]  ;;  %v259_v50 = vld [vmem:[#allocation6 + $0x1a0] sm:$0xff]  ;;  %v124_v51 = vld [vmem:[#allocation6 + $0x90] sm:$0xff] }
  0x1f   :  { %224 = vmatpush.msra.mxu2 %v209_v29  ;;  %146 = vmatpush.msra.mxu0 %v129_v31  ;;  %v104_v48 = vld [vmem:[#allocation6 + $0x18] sm:$0xff]  ;;  %v103_v52 = vld [vmem:[#allocation6 + $0x10] sm:$0xff]  ;;  %v123_v55 = vld [vmem:[#allocation6 + $0x88] sm:$0xff] }
  0x20   :  { %175 = vmatpush.msra.mxu1 %v108_v32  ;;  %278 = vmatpush.msra.mxu3 %v263_v34  ;;  %v204_v49 = vld [vmem:[#allocation6 + $0x118] sm:$0xff]  ;;  %v203_v53 = vld [vmem:[#allocation6 + $0x110] sm:$0xff]  ;;  %v102_v56 = vld [vmem:[#allocation6 + $0x8] sm:$0xff] }
  0x21   :  { %225 = vmatpush.msra.mxu2 %v208_v33  ;;  %147 = vmatpush.msra.mxu0 %v128_v35  ;;  %v258_v54 = vld [vmem:[#allocation6 + $0x198] sm:$0xff]  ;;  %v202_v57 = vld [vmem:[#allocation6 + $0x108] sm:$0xff]  ;;  %v257_v58 = vld [vmem:[#allocation6 + $0x190] sm:$0xff] }
  0x22   :  { %176 = vmatpush.msra.mxu1 %v107_v36  ;;  %279 = vmatpush.msra.mxu3 %v262_v38  ;;  %v122_v59 = vld [vmem:[#allocation6 + $0x80] sm:$0xff]  ;;  %v256_v62 = vld [vmem:[#allocation6 + $0x188] sm:$0xff]  ;;  %v117_v63 = vld [vmem:[%s1556_s0 + $0x1] sm:$0xff] }
  0x23   :  { %226 = vmatpush.msra.mxu2 %v207_v37  ;;  %148 = vmatpush.msra.mxu0 %v127_v39  ;;  %v101_v60 = vld [vmem:[#allocation6] sm:$0xff]  ;;  %v97_v0 = vld [vmem:[%s1556_s0] sm:$0xff]  ;;  %v324_v2 = vld [vmem:[#allocation6 + $0x278] sm:$0xff] }
  0x24   :  { %177 = vmatpush.msra.mxu1 %v106_v40  ;;  %280 = vmatpush.msra.mxu3 %v261_v42  ;;  %v201_v61 = vld [vmem:[#allocation6 + $0x100] sm:$0xff]  ;;  %v196_v1 = vld [vmem:[%s1556_s0 + $0x2] sm:$0xff]  ;;  %v322_v6 = vld [vmem:[#allocation6 + $0x268] sm:$0xff] }
  0x25   :  { %227 = vmatpush.msra.mxu2 %v206_v41  ;;  %149 = vmatpush.msra.mxu0 %v126_v43  ;;  %v255_v3 = vld [vmem:[#allocation6 + $0x180] sm:$0xff]  ;;  %v250_v4 = vld [vmem:[%s1556_s0 + $0x3] sm:$0xff]  ;;  %v318_v14 = vld [vmem:[#allocation6 + $0x248] sm:$0xff] }
  0x26   :  { %178 = vmatpush.msra.mxu1 %v105_v44  ;;  %281 = vmatpush.msra.mxu3 %v260_v46  ;;  %v323_v5 = vld [vmem:[#allocation6 + $0x270] sm:$0xff]  ;;  %v321_v7 = vld [vmem:[#allocation6 + $0x260] sm:$0xff]  ;;  %v98_v9 = vld [vmem:[%s1556_s0 + $0x8] sm:$0xff] }
  0x27   :  { %228 = vmatpush.msra.mxu2 %v205_v45  ;;  %150 = vmatpush.msra.mxu0 %v125_v47  ;;  %v118_v8 = vld [vmem:[%s1556_s0 + $0x9] sm:$0xff]  ;;  %v319_v13 = vld [vmem:[#allocation6 + $0x250] sm:$0xff]  ;;  %v119_v16 = vld [vmem:[%s1556_s0 + $0x11] sm:$0xff] }
  0x28   :  { %179 = vmatpush.msra.mxu1 %v104_v48  ;;  %282 = vmatpush.msra.mxu3 %v259_v50  ;;  %v197_v10 = vld [vmem:[%s1556_s0 + $0xa] sm:$0xff]  ;;  %v198_v18 = vld [vmem:[%s1556_s0 + $0x12] sm:$0xff]  ;;  %v315_v21 = vld [vmem:[#allocation6 + $0x230] sm:$0xff] }
  0x29   :  { %229 = vmatpush.msra.mxu2 %v204_v49  ;;  %151 = vmatpush.msra.mxu0 %v124_v51  ;;  %v320_v11 = vld [vmem:[#allocation6 + $0x258] sm:$0xff]  ;;  %v317_v15 = vld [vmem:[#allocation6 + $0x240] sm:$0xff]  ;;  %v314_v22 = vld [vmem:[#allocation6 + $0x228] sm:$0xff] }
  0x2a   :  { %180 = vmatpush.msra.mxu1 %v103_v52  ;;  %283 = vmatpush.msra.mxu3 %v258_v54  ;;  %v251_v12 = vld [vmem:[%s1556_s0 + $0xb] sm:$0xff]  ;;  %v252_v20 = vld [vmem:[%s1556_s0 + $0x13] sm:$0xff]  ;;  %v253_v28 = vld [vmem:[%s1556_s0 + $0x1b] sm:$0x7f] }
  0x2b   :  { %230 = vmatpush.msra.mxu2 %v203_v53  ;;  %152 = vmatpush.msra.mxu0 %v123_v55  ;;  %v99_v17 = vld [vmem:[%s1556_s0 + $0x10] sm:$0xff]  ;;  %v316_v19 = vld [vmem:[#allocation6 + $0x238] sm:$0xff]  ;;  %v120_v24 = vld [vmem:[%s1556_s0 + $0x19] sm:$0x7f] }
  0x2c   :  { %181 = vmatpush.msra.mxu1 %v102_v56  ;;  %284 = vmatpush.msra.mxu3 %v257_v58  ;;  %v313_v23 = vld [vmem:[#allocation6 + $0x220] sm:$0xff]  ;;  %v100_v25 = vld [vmem:[%s1556_s0 + $0x18] sm:$0x7f]  ;;  %v312_v27 = vld [vmem:[#allocation6 + $0x218] sm:$0xff] }
  0x2d   :  { %231 = vmatpush.msra.mxu2 %v202_v57  ;;  %153 = vmatpush.msra.mxu0 %v122_v59  ;;  %v199_v26 = vld [vmem:[%s1556_s0 + $0x1a] sm:$0x7f]  ;;  %v309_v31 = vld [vmem:[#allocation6 + $0x200] sm:$0xff]  ;;  %v304_v32 = vld [vmem:[%s1556_s0 + $0x4] sm:$0xff] }
  0x2e   :  { %182 = vmatpush.msra.mxu1 %v101_v60  ;;  %285 = vmatpush.msra.mxu3 %v256_v62  ;;  %v311_v29 = vld [vmem:[#allocation6 + $0x210] sm:$0xff]  ;;  %v310_v30 = vld [vmem:[#allocation6 + $0x208] sm:$0xff]  ;;  %v305_v33 = vld [vmem:[%s1556_s0 + $0xc] sm:$0xff] }
  0x2f   :  { %232 = vmatpush.msra.mxu2 %v201_v61  ;;  %154 = vmatmul.f32.vlgmr.msra.gmra.mxu0 %v117_v63  ;;  %v306_v34 = vld [vmem:[%s1556_s0 + $0x14] sm:$0xff]  ;;  %v307_v35 = vld [vmem:[%s1556_s0 + $0x1c] sm:$0x7f]  ;;  %v416_v36 = vld [vmem:[#allocation8 + $0x78] sm:$0xff] }
  0x30   :  { %183 = vmatmul.f32.vlgmr.msra.gmra.mxu1 %v97_v0  ;;  %233 = vmatmul.f32.vlgmr.msra.gmra.mxu2 %v196_v1  ;;  %v415_v37 = vld [vmem:[#allocation8 + $0x70] sm:$0xff]  ;;  %v414_v39 = vld [vmem:[#allocation8 + $0x68] sm:$0xff]  ;;  %v413_v40 = vld [vmem:[#allocation8 + $0x60] sm:$0xff] }
  0x31   :  { %325 = vmatpush.msrb.mxu0 %v324_v2  ;;  %286 = vmatpush.msra.mxu3 %v255_v3  ;;  %v412_v41 = vld [vmem:[#allocation8 + $0x58] sm:$0xff]  ;;  %v411_v43 = vld [vmem:[#allocation8 + $0x50] sm:$0xff]  ;;  %v410_v46 = vld [vmem:[#allocation8 + $0x48] sm:$0xff] }
  0x32   :  { %287 = vmatmul.f32.vlgmr.msra.gmra.mxu3 %v250_v4  ;;  %463 = vmatpush.msrb.mxu2 %v416_v36  ;;  %v436_v42 = vld [vmem:[#allocation8 + $0xf8] sm:$0xff]  ;;  %v435_v44 = vld [vmem:[#allocation8 + $0xf0] sm:$0xff]  ;;  %v434_v47 = vld [vmem:[#allocation8 + $0xe8] sm:$0xff] }
  0x33   :  { %326 = vmatpush.msrb.mxu0 %v323_v5  ;;  %437 = vmatpush.msrb.mxu1 %v436_v42  ;;  %v409_v48 = vld [vmem:[#allocation8 + $0x40] sm:$0xff]  ;;  %v508_v50 = vld [vmem:[#allocation8 + $0x178] sm:$0xff]  ;;  %v507_v54 = vld [vmem:[#allocation8 + $0x170] sm:$0xff] }
  0x34   :  { %464 = vmatpush.msrb.mxu2 %v415_v37  ;;  %v433_v49 = vld [vmem:[#allocation8 + $0xe0] sm:$0xff]  ;;  %v557_v51 = vld [vmem:[#allocation8 + $0x1f8] sm:$0xff]  ;;  %509 = vmatpush.msrb.mxu3 %v508_v50  ;;  %v556_v55 = vld [vmem:[#allocation8 + $0x1f0] sm:$0xff] }
  0x35   :  { %327 = vmatpush.msrb.mxu0 %v322_v6  ;;  %438 = vmatpush.msrb.mxu1 %v435_v44  ;;  %v408_v52 = vld [vmem:[#allocation8 + $0x38] sm:$0xff]  ;;  %v407_v56 = vld [vmem:[#allocation8 + $0x30] sm:$0xff]  ;;  %v506_v60 = vld [vmem:[#allocation8 + $0x168] sm:$0xff] }
  0x36   :  { %465 = vmatpush.msrb.mxu2 %v414_v39  ;;  %v432_v53 = vld [vmem:[#allocation8 + $0xd8] sm:$0xff]  ;;  %510 = vmatpush.msrb.mxu3 %v507_v54  ;;  %v431_v57 = vld [vmem:[#allocation8 + $0xd0] sm:$0xff]  ;;  %v555_v61 = vld [vmem:[#allocation8 + $0x1e8] sm:$0xff] }
  0x37   :  { %328 = vmatpush.msrb.mxu0 %v321_v7  ;;  %439 = vmatpush.msrb.mxu1 %v434_v47  ;;  %v406_v62 = vld [vmem:[#allocation8 + $0x28] sm:$0xff]  ;;  %v505_v1 = vld [vmem:[#allocation8 + $0x160] sm:$0xff]  ;;  %v504_v5 = vld [vmem:[#allocation8 + $0x158] sm:$0xff] }
  0x38   :  { %157 = vmatmul.f32.gmra.mxu0 %v118_v8  ;;  %186 = vmatmul.f32.gmra.mxu1 %v98_v9  ;;  %v430_v63 = vld [vmem:[#allocation8 + $0xc8] sm:$0xff]  ;;  %v554_v2 = vld [vmem:[#allocation8 + $0x1e0] sm:$0xff]  ;;  %v553_v6 = vld [vmem:[#allocation8 + $0x1d8] sm:$0xff] }
  0x39   :  { %236 = vmatmul.f32.gmra.mxu2 %v197_v10  ;;  %329 = vmatpush.msrb.mxu0 %v320_v11  ;;  %v405_v3 = vld [vmem:[#allocation8 + $0x20] sm:$0xff]  ;;  %v404_v7 = vld [vmem:[#allocation8 + $0x18] sm:$0xff]  ;;  %v503_v10 = vld [vmem:[#allocation8 + $0x150] sm:$0xff] }
  0x3a   :  { %290 = vmatmul.f32.gmra.mxu3 %v251_v12  ;;  %466 = vmatpush.msrb.mxu2 %v413_v40  ;;  %v429_v4 = vld [vmem:[#allocation8 + $0xc0] sm:$0xff]  ;;  %v428_v8 = vld [vmem:[#allocation8 + $0xb8] sm:$0xff]  ;;  %v552_v11 = vld [vmem:[#allocation8 + $0x1d0] sm:$0xff] }
  0x3b   :  { %330 = vmatpush.msrb.mxu0 %v319_v13  ;;  %440 = vmatpush.msrb.mxu1 %v433_v49  ;;  %v403_v12 = vld [vmem:[#allocation8 + $0x10] sm:$0xff]  ;;  %v498_v37 = vld [vmem:[#allocation8 + $0x128] sm:$0xff]  ;;  %v497_v42 = vld [vmem:[#allocation8 + $0x120] sm:$0xff] }
  0x3c   :  { %467 = vmatpush.msrb.mxu2 %v412_v41  ;;  %511 = vmatpush.msrb.mxu3 %v506_v60  ;;  %v427_v13 = vld [vmem:[#allocation8 + $0xb0] sm:$0xff]  ;;  %v422_v41 = vld [vmem:[#allocation8 + $0x88] sm:$0xff]  ;;  %v421_v47 = vld [vmem:[#allocation8 + $0x80] sm:$0xff] }
  0x3d   :  { %331 = vmatpush.msrb.mxu0 %v318_v14  ;;  %441 = vmatpush.msrb.mxu1 %v432_v53  ;;  %v496_v49 = vld [vmem:[#allocation8 + $0x118] sm:$0xff]  ;;  %v495_v53 = vld [vmem:[#allocation8 + $0x110] sm:$0xff]  ;;  %v604_v60 = vld [vmem:[#allocation8 + $0x268] sm:$0xff] }
  0x3e   :  { %468 = vmatpush.msrb.mxu2 %v411_v43  ;;  %512 = vmatpush.msrb.mxu3 %v505_v1  ;;  %v546_v43 = vld [vmem:[#allocation8 + $0x1a0] sm:$0xff]  ;;  %v545_v50 = vld [vmem:[#allocation8 + $0x198] sm:$0xff]  ;;  %v544_v54 = vld [vmem:[#allocation8 + $0x190] sm:$0xff] }
  0x3f   :  { %332 = vmatpush.msrb.mxu0 %v317_v15  ;;  %442 = vmatpush.msrb.mxu1 %v431_v57  ;;  %v502_v15 = vld [vmem:[#allocation8 + $0x148] sm:$0xff] }
  0x40   :  { %160 = vmatmul.f32.gmra.mxu0 %v119_v16  ;;  %189 = vmatmul.f32.gmra.mxu1 %v99_v17  ;;  %v551_v16 = vld [vmem:[#allocation8 + $0x1c8] sm:$0xff] }
  0x41   :  { %239 = vmatmul.f32.gmra.mxu2 %v198_v18  ;;  %333 = vmatpush.msrb.mxu0 %v316_v19  ;;  %v402_v17 = vld [vmem:[#allocation8 + $0x8] sm:$0xff] }
  0x42   :  { %293 = vmatmul.f32.gmra.mxu3 %v252_v20  ;;  %469 = vmatpush.msrb.mxu2 %v410_v46  ;;  %v426_v19 = vld [vmem:[#allocation8 + $0xa8] sm:$0xff] }
  0x43   :  { %334 = vmatpush.msrb.mxu0 %v315_v21  ;;  %443 = vmatpush.msrb.mxu1 %v430_v63  ;;  %v501_v21 = vld [vmem:[#allocation8 + $0x140] sm:$0xff]  ;;  %v494_v57 = vld [vmem:[#allocation8 + $0x108] sm:$0xff] }
  0x44   :  { %470 = vmatpush.msrb.mxu2 %v409_v48  ;;  %513 = vmatpush.msrb.mxu3 %v504_v5  ;;  %v542_v63 = vld [vmem:[#allocation8 + $0x180] sm:$0xff] }
  0x45   :  { %335 = vmatpush.msrb.mxu0 %v314_v22  ;;  %444 = vmatpush.msrb.mxu1 %v429_v4  ;;  %v550_v22 = vld [vmem:[#allocation8 + $0x1c0] sm:$0xff] }
  0x46   :  { %471 = vmatpush.msrb.mxu2 %v408_v52  ;;  %514 = vmatpush.msrb.mxu3 %v503_v10 }
  0x47   :  { %336 = vmatpush.msrb.mxu0 %v313_v23  ;;  %445 = vmatpush.msrb.mxu1 %v428_v8  ;;  %v401_v23 = vld [vmem:[#allocation8] sm:$0xff]  ;;  %v601_v8 = vld [vmem:[#allocation8 + $0x250] sm:$0xff] }
  0x48   :  { %163 = vmatmul.f32.gmra.mxu0 %v120_v24  ;;  %192 = vmatmul.f32.gmra.mxu1 %v100_v25  ;;  %v425_v25 = vld [vmem:[#allocation8 + $0xa0] sm:$0xff] }
  0x49   :  { %242 = vmatmul.f32.gmra.mxu2 %v199_v26  ;;  %337 = vmatpush.msrb.mxu0 %v312_v27  ;;  %v500_v27 = vld [vmem:[#allocation8 + $0x138] sm:$0xff] }
  0x4a   :  { %296 = vmatmul.f32.gmra.mxu3 %v253_v28  ;;  %472 = vmatpush.msrb.mxu2 %v407_v56  ;;  %v549_v28 = vld [vmem:[#allocation8 + $0x1b8] sm:$0xff] }
  0x4b   :  { %338 = vmatpush.msrb.mxu0 %v311_v29  ;;  %446 = vmatpush.msrb.mxu1 %v427_v13  ;;  %v424_v29 = vld [vmem:[#allocation8 + $0x98] sm:$0xff] }
  0x4c   :  { %473 = vmatpush.msrb.mxu2 %v406_v62  ;;  %515 = vmatpush.msrb.mxu3 %v502_v15  ;;  %v493_v62 = vld [vmem:[#allocation8 + $0x100] sm:$0xff] }
  0x4d   :  { %339 = vmatpush.msrb.mxu0 %v310_v30  ;;  %447 = vmatpush.msrb.mxu1 %v426_v19  ;;  %v499_v30 = vld [vmem:[#allocation8 + $0x130] sm:$0xff] }
  0x4e   :  { %474 = vmatpush.msrb.mxu2 %v405_v3  ;;  %516 = vmatpush.msrb.mxu3 %v501_v21 }
  0x4f   :  { %340 = vmatpush.msrb.mxu0 %v309_v31  ;;  %448 = vmatpush.msrb.mxu1 %v425_v25  ;;  %v548_v31 = vld [vmem:[#allocation8 + $0x1b0] sm:$0xff] }
  0x50   :  { %341 = vmatmul.f32.vlgmr.msrb.gmra.mxu0 %v304_v32  ;;  %475 = vmatpush.msrb.mxu2 %v404_v7 }
  0x51   :  { %558 = vmatpush.msra.mxu0 %v557_v51  ;;  %517 = vmatpush.msrb.mxu3 %v500_v27  ;;  %v606_v51 = vld [vmem:[#allocation8 + $0x278] sm:$0xff] }
  0x52   :  { %476 = vmatpush.msrb.mxu2 %v403_v12  ;;  %449 = vmatpush.msrb.mxu1 %v424_v29 }
  0x53   :  { %559 = vmatpush.msra.mxu0 %v556_v55  ;;  %518 = vmatpush.msrb.mxu3 %v499_v30  ;;  %v605_v55 = vld [vmem:[#allocation8 + $0x270] sm:$0xff]  ;;  %v595_v30 = vld [vmem:[#allocation8 + $0x220] sm:$0xff] }
  0x54   :  { %477 = vmatpush.msrb.mxu2 %v402_v17 }
  0x55   :  { %560 = vmatpush.msra.mxu0 %v555_v61  ;;  %519 = vmatpush.msrb.mxu3 %v498_v37 }
  0x56   :  { %478 = vmatpush.msrb.mxu2 %v401_v23  ;;  %v597_v23 = vld [vmem:[#allocation8 + $0x230] sm:$0xff] }
  0x57   :  { %561 = vmatpush.msra.mxu0 %v554_v2  ;;  %520 = vmatpush.msrb.mxu3 %v497_v42  ;;  %v603_v2 = vld [vmem:[#allocation8 + $0x260] sm:$0xff] }
  0x58   :  { %344 = vmatmul.f32.gmra.mxu0 %v305_v33  ;;  %v1385_v33 = vld [vmem:[%s1558_s2] ss:$0 sm:$0xff] }
  0x59   :  { %562 = vmatpush.msra.mxu0 %v553_v6  ;;  %521 = vmatpush.msrb.mxu3 %v496_v49  ;;  %v602_v6 = vld [vmem:[#allocation8 + $0x258] sm:$0xff] }
  0x5b   :  { %563 = vmatpush.msra.mxu0 %v552_v11  ;;  %522 = vmatpush.msrb.mxu3 %v495_v53 }
  0x5d   :  { %564 = vmatpush.msra.mxu0 %v551_v16  ;;  %523 = vmatpush.msrb.mxu3 %v494_v57  ;;  %v599_v16 = vld [vmem:[#allocation8 + $0x240] sm:$0xff] }
  0x5f   :  { %565 = vmatpush.msra.mxu0 %v550_v22  ;;  %524 = vmatpush.msrb.mxu3 %v493_v62  ;;  %v1135_v22 = vld [vmem:[%s1559_s3] ss:$0 sm:$0xff]  ;;  %v698_v62 = vld [vmem:[#allocation10 + $0xe8] sm:$0xff] }
  0x60   :  { %347 = vmatmul.f32.gmra.mxu0 %v306_v34  ;;  %v423_v34 = vld [vmem:[#allocation8 + $0x90] sm:$0xff] }
  0x61   :  { %566 = vmatpush.msra.mxu0 %v549_v28  ;;  %450 = vmatpush.msrb.mxu1 %v423_v34 }
  0x63   :  { %567 = vmatpush.msra.mxu0 %v548_v31  ;;  %451 = vmatpush.msrb.mxu1 %v422_v41 }
  0x65   :  { %452 = vmatpush.msrb.mxu1 %v421_v47 }
  0x67   :  { %607 = vmatpush.msra.mxu1 %v606_v51 }
  0x68   :  { %350 = vmatmul.f32.gmra.mxu0 %v307_v35 }
  0x69   :  { %608 = vmatpush.msra.mxu1 %v605_v55 }
  0x6b   :  { %609 = vmatpush.msra.mxu1 %v604_v60  ;;  %v700_v60 = vld [vmem:[#allocation10 + $0xf8] sm:$0xff] }
  0x6d   :  { %610 = vmatpush.msra.mxu1 %v603_v2  ;;  %v694_v2 = vld [vmem:[#allocation10 + $0xc8] sm:$0xff] }
  0x6f   :  { %611 = vmatpush.msra.mxu1 %v602_v6  ;;  %v692_v6 = vld [vmem:[#allocation10 + $0xb8] sm:$0xff] }
  0x71   :  { %612 = vmatpush.msra.mxu1 %v601_v8  ;;  %v732_v8 = vld [vmem:[#allocation10 + $0x1e8] sm:$0xff] }
  0xac   :  { %v1373_v38 = vpop.f32.mrf.mxu0 }
  0xad   :  { %v184_v58 = vpop.f32.mrf.mxu1 }
  0xae   :  { %v185_v18 = vadd.f32 %v184_v58, %v1373_v38  ;;  %v547_v38 = vld [vmem:[#allocation8 + $0x1a8] sm:$0xff] }
  0xaf   :  { %568 = vmatpush.msra.mxu0 %v547_v38  ;;  %v543_v58 = vld [vmem:[#allocation8 + $0x188] sm:$0xff] }
  0xb0   :  { %v592_v38 = vld [vmem:[#allocation8 + $0x208] sm:$0xff] }
  0xb1   :  { %569 = vmatpush.msra.mxu0 %v546_v43 }
  0xb3   :  { %v234_v0 = vpop.f32.mrf.mxu2  ;;  %570 = vmatpush.msra.mxu0 %v545_v50 }
  0xb4   :  { %v246_v24 = vadd.f32 %v234_v0, %v185_v18 }
  0xb5   :  { %v1375_v45 = vpop.f32.mrf.mxu0  ;;  %v288_v9 = vpop.f32.mrf.mxu3  ;;  %571 = vmatpush.msra.mxu0 %v544_v54 }
  0xb6   :  { %v187_v20 = vpop.f32.mrf.mxu1  ;;  %v300_v32 = vadd.f32 %v288_v9, %v246_v24 }
  0xb7   :  { %v188_v39 = vadd.f32 %v187_v20, %v1375_v45  ;;  %572 = vmatpush.msra.mxu0 %v543_v58  ;;  %v598_v20 = vld [vmem:[#allocation8 + $0x238] sm:$0xff]  ;;  %v699_v58 = vld [vmem:[#allocation10 + $0xf0] sm:$0xff] }
  0xb9   :  { %573 = vmatpush.msra.mxu0 %v542_v63  ;;  %v695_v63 = vld [vmem:[#allocation10 + $0xd0] sm:$0xff] }
  0xbb   :  { %775 = vmatpush.msrb.mxu0 %v699_v58  ;;  %v707_v58 = vld [vmem:[#allocation10 + $0x120] sm:$0xff] }
  0xbc   :  { %v237_v26 = vpop.f32.mrf.mxu2 }
  0xbd   :  { %v1377_v59 = vpop.f32.mrf.mxu0  ;;  %v291_v35 = vpop.f32.mrf.mxu3  ;;  %v247_v44 = vadd.f32 %v237_v26, %v188_v39  ;;  %v596_v26 = vld [vmem:[#allocation8 + $0x228] sm:$0xff] }
  0xbe   :  { %v190_v48 = vpop.f32.mrf.mxu1 }
  0xbf   :  { %v301_v56 = vadd.f32 %v291_v35, %v247_v44  ;;  %v191_v0 = vadd.f32 %v190_v48, %v1377_v59  ;;  %v600_v59 = vld [vmem:[#allocation8 + $0x248] sm:$0xff]  ;;  %v593_v35 = vld [vmem:[#allocation8 + $0x210] sm:$0xff] }
  0xc0   :  { %613 = vmatpush.msra.mxu1 %v600_v59  ;;  %v729_v59 = vld [vmem:[#allocation10 + $0x1d0] sm:$0xff] }
  0xc2   :  { %614 = vmatpush.msra.mxu1 %v599_v16  ;;  %v728_v16 = vld [vmem:[#allocation10 + $0x1c8] sm:$0xff] }
  0xc4   :  { %v240_v52 = vpop.f32.mrf.mxu2  ;;  %615 = vmatpush.msra.mxu1 %v598_v20  ;;  %v726_v20 = vld [vmem:[#allocation10 + $0x1b8] sm:$0xff] }
  0xc5   :  { %v1379_v14 = vpop.f32.mrf.mxu0  ;;  %v294_v3 = vpop.f32.mrf.mxu3  ;;  %v248_v4 = vadd.f32 %v240_v52, %v191_v0  ;;  %v696_v0 = vld [vmem:[#allocation10 + $0xd8] sm:$0xff] }
  0xc6   :  { %v193_v9 = vpop.f32.mrf.mxu1  ;;  %616 = vmatpush.msra.mxu1 %v597_v23  ;;  %v723_v23 = vld [vmem:[#allocation10 + $0x1a0] sm:$0xff] }
  0xc7   :  { %v302_v10 = vadd.f32 %v294_v3, %v248_v4  ;;  %v194_v13 = vadd.f32 %v193_v9, %v1379_v14  ;;  %v733_v3 = vld [vmem:[#allocation10 + $0x1f0] sm:$0xff]  ;;  %v734_v4 = vld [vmem:[#allocation10 + $0x1f8] sm:$0xff]  ;;  %v689_v9 = vld [vmem:[#allocation10 + $0xa0] sm:$0xff] }
  0xc8   :  { %617 = vmatpush.msra.mxu1 %v596_v26  ;;  %735 = vmatpush.msra.mxu2 %v733_v3  ;;  %v721_v26 = vld [vmem:[#allocation10 + $0x190] sm:$0xff] }
  0xc9   :  { %755 = vmatpush.msra.mxu3 %v734_v4  ;;  %v703_v4 = vld [vmem:[#allocation10 + $0x100] sm:$0xff] }
  0xca   :  { %618 = vmatpush.msra.mxu1 %v595_v30  ;;  %v719_v30 = vld [vmem:[#allocation10 + $0x180] sm:$0xff] }
  0xcb   :  { %756 = vmatpush.msra.mxu3 %v732_v8  ;;  %v848_v8 = vld [vmem:[#allocation10 + $0x2f8] sm:$0xff] }
  0xcc   :  { %v243_v11 = vpop.f32.mrf.mxu2 }
  0xcd   :  { %v342_v36 = vpop.f32.mrf.mxu0  ;;  %v249_v17 = vadd.f32 %v243_v11, %v194_v13  ;;  %v297_v19 = vpop.f32.mrf.mxu3  ;;  %v730_v11 = vld [vmem:[#allocation10 + $0x1d8] sm:$0xff] }
  0xce   :  { %v354_v40 = vadd.f32 %v342_v36, %v300_v32  ;;  %v594_v32 = vld [vmem:[#allocation8 + $0x218] sm:$0xff]  ;;  %757 = vmatpush.msra.mxu3 %v730_v11  ;;  %v846_v11 = vld [vmem:[#allocation10 + $0x2e8] sm:$0xff] }
  0xcf   :  { %v303_v25 = vadd.f32 %v297_v19, %v249_v17  ;;  %619 = vmatpush.msra.mxu1 %v594_v32  ;;  %v688_v13 = vld [vmem:[#allocation10 + $0x98] sm:$0xff]  ;;  %v685_v17 = vld [vmem:[#allocation10 + $0x80] sm:$0xff]  ;;  %v725_v19 = vld [vmem:[#allocation10 + $0x1b0] sm:$0xff] }
  0xd0   :  { %v1389_v46 = vadd.f32 %v1385_v33, %v354_v40  ;;  %v591_v40 = vld [vmem:[#allocation8 + $0x200] sm:$0xff]  ;;  %758 = vmatpush.msra.mxu3 %v728_v16 }
  0xd1   :  { %620 = vmatpush.msra.mxu1 %v593_v35  ;;  %v677_v32 = vld [vmem:[#allocation10 + $0x40] sm:$0xff]  ;;  %v717_v35 = vld [vmem:[#allocation10 + $0x170] sm:$0xff] }
  0xd2   :  { %v366_v45 = vmax.f32 %v1389_v46, 0.0  ;;  %759 = vmatpush.msra.mxu3 %v726_v20 }
  0xd3   :  { %621 = vmatpush.msra.mxu1 %v592_v38  ;;  %v676_v38 = vld [vmem:[#allocation10 + $0x38] sm:$0xff] }
  0xd4   :  { %370 = vst [vmem:[#allocation2] sm:$0xff] %v366_v45 }
  0xd5   :  { %v345_v61 = vpop.f32.mrf.mxu0  ;;  %622 = vmatpush.msra.mxu1 %v591_v40  ;;  %v716_v40 = vld [vmem:[#allocation10 + $0x168] sm:$0xff] }
  0xd6   :  { %v355_v1 = vadd.f32 %v345_v61, %v301_v56  ;;  %v697_v61 = vld [vmem:[#allocation10 + $0xe0] sm:$0xff] }
  0xd7   :  { %776 = vmatpush.msrb.mxu0 %v697_v61  ;;  %v919_v61 = vld [vmem:[#allocation10 + $0x3d0] sm:$0xff] }
  0xd8   :  { %v363_v5 = vadd.f32 %v1385_v33, %v355_v1  ;;  %v693_v1 = vld [vmem:[#allocation10 + $0xc0] sm:$0xff] }
  0xd9   :  { %777 = vmatpush.msrb.mxu0 %v695_v63  ;;  %v705_v63 = vld [vmem:[#allocation10 + $0x110] sm:$0xff] }
  0xda   :  { %v367_v7 = vmax.f32 %v363_v5, 0.0  ;;  %v691_v5 = vld [vmem:[#allocation10 + $0xb0] sm:$0xff] }
  0xdb   :  { %778 = vmatpush.msrb.mxu0 %v693_v1  ;;  %v917_v1 = vld [vmem:[#allocation10 + $0x3c0] sm:$0xff] }
  0xdc   :  { %371 = vst [vmem:[#allocation2 + $0x8] sm:$0xff] %v367_v7 }
  0xdd   :  { %v348_v12 = vpop.f32.mrf.mxu0  ;;  %779 = vmatpush.msrb.mxu0 %v691_v5  ;;  %v704_v5 = vld [vmem:[#allocation10 + $0x108] sm:$0xff] }
  0xde   :  { %v356_v15 = vadd.f32 %v348_v12, %v302_v10  ;;  %v690_v10 = vld [vmem:[#allocation10 + $0xa8] sm:$0xff]  ;;  %v687_v12 = vld [vmem:[#allocation10 + $0x90] sm:$0xff] }
  0xdf   :  { %780 = vmatpush.msrb.mxu0 %v689_v9  ;;  %v915_v9 = vld [vmem:[#allocation10 + $0x3b0] sm:$0xff] }
  0xe0   :  { %v364_v18 = vadd.f32 %v1385_v33, %v356_v15  ;;  %v727_v15 = vld [vmem:[#allocation10 + $0x1c0] sm:$0xff] }
  0xe1   :  { %781 = vmatpush.msrb.mxu0 %v687_v12  ;;  %v913_v12 = vld [vmem:[#allocation10 + $0x3a0] sm:$0xff] }
  0xe2   :  { %v368_v21 = vmax.f32 %v364_v18, 0.0  ;;  %v686_v18 = vld [vmem:[#allocation10 + $0x88] sm:$0xff] }
  0xe3   :  { %v378_v24 = vld [vmem:[#allocation2 + $0x1] sm:$0xff]  ;;  %782 = vmatpush.msrb.mxu0 %v685_v17 }
  0xe4   :  { %372 = vst [vmem:[#allocation2 + $0x10] sm:$0xff] %v368_v21  ;;  %v382_v14 = vmax.f32 %v366_v45, %v378_v24  ;;  %v724_v24 = vld [vmem:[#allocation10 + $0x1a8] sm:$0xff]  ;;  %v843_v17 = vld [vmem:[#allocation10 + $0x2d0] sm:$0xff] }
  0xe5   :  { %v351_v27 = vpop.f32.mrf.mxu0  ;;  %760 = vmatpush.msra.mxu3 %v724_v24  ;;  %v842_v24 = vld [vmem:[#allocation10 + $0x2c8] sm:$0xff] }
  0xe6   :  { %v357_v28 = vadd.f32 %v351_v27, %v303_v25  ;;  %v390_v29 = vadd.f32 %v1135_v22, %v382_v14  ;;  %v681_v25 = vld [vmem:[#allocation10 + $0x60] sm:$0xff]  ;;  %v682_v14 = vld [vmem:[#allocation10 + $0x68] sm:$0xff]  ;;  %v722_v27 = vld [vmem:[#allocation10 + $0x198] sm:$0xff] }
  0xe7   :  { %761 = vmatpush.msra.mxu3 %v722_v27  ;;  %v840_v27 = vld [vmem:[#allocation10 + $0x2b8] sm:$0xff] }
  0xe8   :  { %v365_v31 = vadd.f32 %v1385_v33, %v357_v28  ;;  %394 = vst [vmem:[#allocation3] sm:$0xff] %v390_v29  ;;  %479 = vmatmul.f32.vlgmr.msrb.gmra.mxu2 %v390_v29  ;;  %v679_v28 = vld [vmem:[#allocation10 + $0x50] sm:$0xff]  ;;  %v680_v29 = vld [vmem:[#allocation10 + $0x58] sm:$0xff] }
  0xea   :  { %v369_v34 = vmax.f32 %v365_v31, 0.0  ;;  %v720_v31 = vld [vmem:[#allocation10 + $0x188] sm:$0xff] }
  0xeb   :  { %v379_v36 = vld [vmem:[#allocation2 + $0x9] sm:$0xff]  ;;  %762 = vmatpush.msra.mxu3 %v720_v31 }
  0xec   :  { %373 = vst [vmem:[#allocation2 + $0x18] sm:$0x7f] %v369_v34  ;;  %v383_v37 = vmax.f32 %v367_v7, %v379_v36  ;;  %v731_v7 = vld [vmem:[#allocation10 + $0x1e0] sm:$0xff]  ;;  %v678_v34 = vld [vmem:[#allocation10 + $0x48] sm:$0xff]  ;;  %v718_v36 = vld [vmem:[#allocation10 + $0x178] sm:$0xff] }
  0xed   :  { %736 = vmatpush.msra.mxu2 %v731_v7  ;;  %763 = vmatpush.msra.mxu3 %v718_v36  ;;  %v847_v7 = vld [vmem:[#allocation10 + $0x2f0] sm:$0xff]  ;;  %v908_v31 = vld [vmem:[#allocation10 + $0x378] sm:$0xff]  ;;  %v838_v36 = vld [vmem:[#allocation10 + $0x2a8] sm:$0xff] }
  0xee   :  { %v391_v39 = vadd.f32 %v1135_v22, %v383_v37  ;;  %v675_v37 = vld [vmem:[#allocation10 + $0x30] sm:$0xff] }
  0xef   :  { %737 = vmatpush.msra.mxu2 %v729_v59  ;;  %764 = vmatpush.msra.mxu3 %v716_v40  ;;  %v845_v59 = vld [vmem:[#allocation10 + $0x2e0] sm:$0xff]  ;;  %v835_v40 = vld [vmem:[#allocation10 + $0x290] sm:$0xff] }
  0xf0   :  { %395 = vst [vmem:[#allocation3 + $0x8] sm:$0xff] %v391_v39  ;;  %482 = vmatmul.f32.gmra.mxu2 %v391_v39 }
  0xf1   :  { %738 = vmatpush.msra.mxu2 %v727_v15  ;;  %v914_v15 = vld [vmem:[#allocation10 + $0x3a8] sm:$0xff] }
  0xf3   :  { %v377_v41 = vld [vmem:[#allocation2 + $0x18] sm:$0x3f]  ;;  %739 = vmatpush.msra.mxu2 %v725_v19  ;;  %v911_v19 = vld [vmem:[#allocation10 + $0x390] sm:$0xff] }
  0xf4   :  { %v380_v33 = vld [vmem:[#allocation2 + $0x11] sm:$0xff]  ;;  %v381_v42 = vld [vmem:[#allocation2 + $0x19] sm:$0x3f] }
  0xf5   :  { %v384_v43 = vmax.f32 %v368_v21, %v380_v33  ;;  %v385_v44 = vmax.f32 %v377_v41, %v381_v42  ;;  %v683_v21 = vld [vmem:[#allocation10 + $0x70] sm:$0xff]  ;;  %740 = vmatpush.msra.mxu2 %v723_v23  ;;  %v673_v33 = vld [vmem:[#allocation10 + $0x20] sm:$0xff]  ;;  %v674_v42 = vld [vmem:[#allocation10 + $0x28] sm:$0xff] }
  0xf6   :  { %783 = vmatpush.msrb.mxu0 %v683_v21  ;;  %v912_v21 = vld [vmem:[#allocation10 + $0x398] sm:$0xff]  ;;  %v841_v23 = vld [vmem:[#allocation10 + $0x2c0] sm:$0xff] }
  0xf7   :  { %v392_v46 = vadd.f32 %v1135_v22, %v384_v43  ;;  %v393_v47 = vadd.f32 %v1135_v22, %v385_v44  ;;  %v417_v48 = vld [vmem:[#allocation3 + $0x2] sm:$0xff]  ;;  %741 = vmatpush.msra.mxu2 %v721_v26 }
  0xf8   :  { %v489_v49 = vld [vmem:[#allocation3 + $0x4] sm:$0xff]  ;;  %453 = vmatmul.f32.vlgmr.msrb.gmra.mxu1 %v417_v48  ;;  %784 = vmatpush.msrb.mxu0 %v681_v25  ;;  %v711_v48 = vld [vmem:[#allocation10 + $0x140] sm:$0xff] }
  0xf9   :  { %v538_v50 = vld [vmem:[#allocation3 + $0x6] sm:$0xff]  ;;  %525 = vmatmul.f32.vlgmr.msrb.gmra.mxu3 %v489_v49  ;;  %396 = vst [vmem:[#allocation3 + $0x10] sm:$0xff] %v392_v46  ;;  %795 = vmatpush.msrb.mxu1 %v700_v60  ;;  %v712_v49 = vld [vmem:[#allocation10 + $0x148] sm:$0xff]  ;;  %v909_v25 = vld [vmem:[#allocation10 + $0x380] sm:$0xff] }
  0xfa   :  { %574 = vmatmul.f32.vlgmr.msra.gmra.mxu0 %v538_v50  ;;  %397 = vst [vmem:[#allocation3 + $0x18] sm:$0x3f] %v393_v47  ;;  %v684_v22 = vld [vmem:[#allocation10 + $0x78] sm:$0xff]  ;;  %742 = vmatpush.msra.mxu2 %v719_v30  ;;  %v713_v43 = vld [vmem:[#allocation10 + $0x150] sm:$0xff]  ;;  %v669_v50 = vld [vmem:[#allocation10] sm:$0xff] }
  0xfb   :  { %796 = vmatpush.msrb.mxu1 %v698_v62  ;;  %785 = vmatpush.msrb.mxu0 %v679_v28  ;;  %v714_v44 = vld [vmem:[#allocation10 + $0x158] sm:$0xff]  ;;  %v708_v60 = vld [vmem:[#allocation10 + $0x128] sm:$0xff]  ;;  %v839_v26 = vld [vmem:[#allocation10 + $0x2b0] sm:$0xff] }
  0xfc   :  { %743 = vmatpush.msra.mxu2 %v717_v35  ;;  %765 = vmatpush.msra.mxu3 %v714_v44  ;;  %v672_v47 = vld [vmem:[#allocation10 + $0x18] sm:$0xff]  ;;  %v907_v28 = vld [vmem:[#allocation10 + $0x370] sm:$0xff]  ;;  %v837_v35 = vld [vmem:[#allocation10 + $0x2a0] sm:$0xff] }
  0xfd   :  { %797 = vmatpush.msrb.mxu1 %v696_v0  ;;  %786 = vmatpush.msrb.mxu0 %v677_v32  ;;  %v920_v62 = vld [vmem:[#allocation10 + $0x3d8] sm:$0xff]  ;;  %v1410_v30 = vld [vmem:[%s1561_s5] ss:$0 sm:$0xff] }
  0xfe   :  { %766 = vmatpush.msra.mxu3 %v712_v49  ;;  %v706_v0 = vld [vmem:[#allocation10 + $0x118] sm:$0xff] }
  0xff   :  { %798 = vmatpush.msrb.mxu1 %v694_v2  ;;  %787 = vmatpush.msrb.mxu0 %v675_v37  ;;  %v918_v2 = vld [vmem:[#allocation10 + $0x3c8] sm:$0xff]  ;;  %v905_v37 = vld [vmem:[#allocation10 + $0x360] sm:$0xff]  ;;  %v904_v44 = vld [vmem:[#allocation10 + $0x358] sm:$0xff] }
 0x100   :  { %v418_v51 = vld [vmem:[#allocation3 + $0xa] sm:$0xff]  ;;  %v419_v54 = vld [vmem:[#allocation3 + $0x12] sm:$0x3f] }
 0x101   :  { %v400_v45 = vld [vmem:[#allocation3 + $0x10] sm:$0x3f]  ;;  %456 = vmatmul.f32.gmra.mxu1 %v418_v51  ;;  %v540_v56 = vld [vmem:[#allocation3 + $0x16] sm:$0x3f]  ;;  %788 = vmatpush.msrb.mxu0 %v673_v33 }
 0x102   :  { %v490_v52 = vld [vmem:[#allocation3 + $0xc] sm:$0xff]  ;;  %485 = vmatmul.f32.gmra.mxu2 %v400_v45  ;;  %v491_v55 = vld [vmem:[#allocation3 + $0x14] sm:$0x3f]  ;;  %799 = vmatpush.msrb.mxu1 %v692_v6  ;;  %v923_v45 = vld [vmem:[#allocation10 + $0x3f0] sm:$0xff] }
 0x103   :  { %v539_v53 = vld [vmem:[#allocation3 + $0xe] sm:$0xff]  ;;  %528 = vmatmul.f32.gmra.mxu3 %v490_v52  ;;  %v589_v57 = vld [vmem:[#allocation3 + $0x18] sm:$0x3f] }
 0x104   :  { %577 = vmatmul.f32.gmra.mxu0 %v539_v53  ;;  %800 = vmatpush.msrb.mxu1 %v690_v10  ;;  %v670_v51 = vld [vmem:[#allocation10 + $0x8] sm:$0xff]  ;;  %v924_v52 = vld [vmem:[#allocation10 + $0x3f8] sm:$0xff]  ;;  %v709_v53 = vld [vmem:[#allocation10 + $0x130] sm:$0xff] }
 0x105   :  { %v916_v10 = vld [vmem:[#allocation10 + $0x3b8] sm:$0xff] }
 0x106   :  { %801 = vmatpush.msrb.mxu1 %v688_v13 }
 0x108   :  { %802 = vmatpush.msrb.mxu1 %v686_v18  ;;  %v844_v18 = vld [vmem:[#allocation10 + $0x2d8] sm:$0xff] }
 0x109   :  { %459 = vmatmul.f32.gmra.mxu1 %v419_v54  ;;  %v710_v54 = vld [vmem:[#allocation10 + $0x138] sm:$0xff] }
 0x10a   :  { %803 = vmatpush.msrb.mxu1 %v684_v22  ;;  %767 = vmatpush.msra.mxu3 %v710_v54 }
 0x10b   :  { %531 = vmatmul.f32.gmra.mxu3 %v491_v55  ;;  %v921_v55 = vld [vmem:[#allocation10 + $0x3e0] sm:$0xff] }
 0x10c   :  { %580 = vmatmul.f32.gmra.mxu0 %v540_v56  ;;  %804 = vmatpush.msrb.mxu1 %v682_v14  ;;  %v922_v56 = vld [vmem:[#allocation10 + $0x3e8] sm:$0xff] }
 0x10d   :  { %768 = vmatpush.msra.mxu3 %v708_v60  ;;  %v910_v14 = vld [vmem:[#allocation10 + $0x388] sm:$0xff] }
 0x10e   :  { %805 = vmatpush.msrb.mxu1 %v680_v29 }
 0x10f   :  { %769 = vmatpush.msra.mxu3 %v706_v0 }
 0x110   :  { %806 = vmatpush.msrb.mxu1 %v678_v34 }
 0x111   :  { %623 = vmatmul.f32.vlgmr.msra.gmra.mxu1 %v391_v39  ;;  %v715_v39 = vld [vmem:[#allocation10 + $0x160] sm:$0xff]  ;;  %770 = vmatpush.msra.mxu3 %v704_v5 }
 0x112   :  { %807 = vmatpush.msrb.mxu1 %v676_v38  ;;  %744 = vmatpush.msra.mxu2 %v715_v39  ;;  %v906_v39 = vld [vmem:[#allocation10 + $0x368] sm:$0xff] }
 0x113   :  { %869 = vmatpush.msrb.mxu3 %v848_v8  ;;  %v825_v8 = vld [vmem:[#allocation10 + $0x240] sm:$0xff] }
 0x114   :  { %808 = vmatpush.msrb.mxu1 %v674_v42  ;;  %745 = vmatpush.msra.mxu2 %v713_v43  ;;  %v903_v43 = vld [vmem:[#allocation10 + $0x350] sm:$0xff] }
 0x115   :  { %870 = vmatpush.msrb.mxu3 %v846_v11  ;;  %v893_v11 = vld [vmem:[#allocation10 + $0x300] sm:$0xff] }
 0x116   :  { %809 = vmatpush.msrb.mxu1 %v672_v47  ;;  %746 = vmatpush.msra.mxu2 %v711_v48  ;;  %v834_v47 = vld [vmem:[#allocation10 + $0x288] sm:$0xff] }
 0x117   :  { %871 = vmatpush.msrb.mxu3 %v844_v18  ;;  %v821_v18 = vld [vmem:[#allocation10 + $0x220] sm:$0xff] }
 0x118   :  { %810 = vmatpush.msrb.mxu1 %v670_v51  ;;  %747 = vmatpush.msra.mxu2 %v709_v53  ;;  %v902_v51 = vld [vmem:[#allocation10 + $0x348] sm:$0xff]  ;;  %v832_v53 = vld [vmem:[#allocation10 + $0x278] sm:$0xff] }
 0x119   :  { %626 = vmatmul.f32.gmra.mxu1 %v392_v46  ;;  %v671_v46 = vld [vmem:[#allocation10 + $0x10] sm:$0xff]  ;;  %872 = vmatpush.msrb.mxu3 %v842_v24 }
 0x11a   :  { %789 = vmatpush.msrb.mxu0 %v671_v46  ;;  %945 = vmatpush.msra.mxu1 %v924_v52  ;;  %v833_v46 = vld [vmem:[#allocation10 + $0x280] sm:$0xff]  ;;  %v831_v52 = vld [vmem:[#allocation10 + $0x270] sm:$0xff] }
 0x11b   :  { %748 = vmatpush.msra.mxu2 %v707_v58  ;;  %873 = vmatpush.msrb.mxu3 %v840_v27  ;;  %v830_v58 = vld [vmem:[#allocation10 + $0x268] sm:$0xff] }
 0x11c   :  { %790 = vmatpush.msrb.mxu0 %v669_v50  ;;  %946 = vmatpush.msra.mxu1 %v922_v56  ;;  %v901_v50 = vld [vmem:[#allocation10 + $0x340] sm:$0xff]  ;;  %v900_v56 = vld [vmem:[#allocation10 + $0x338] sm:$0xff] }
 0x11d   :  { %749 = vmatpush.msra.mxu2 %v705_v63  ;;  %874 = vmatpush.msrb.mxu3 %v838_v36  ;;  %v898_v63 = vld [vmem:[#allocation10 + $0x328] sm:$0xff] }
 0x11e   :  { %925 = vmatpush.msra.mxu0 %v923_v45  ;;  %947 = vmatpush.msra.mxu1 %v920_v62  ;;  %v897_v62 = vld [vmem:[#allocation10 + $0x320] sm:$0xff] }
 0x11f   :  { %750 = vmatpush.msra.mxu2 %v703_v4 }
 0x120   :  { %926 = vmatpush.msra.mxu0 %v921_v55  ;;  %948 = vmatpush.msra.mxu1 %v918_v2  ;;  %v899_v55 = vld [vmem:[#allocation10 + $0x330] sm:$0xff] }
 0x121   :  { %629 = vmatmul.f32.gmra.mxu1 %v589_v57  ;;  %849 = vmatpush.msrb.mxu2 %v847_v7  ;;  %v827_v2 = vld [vmem:[#allocation10 + $0x250] sm:$0xff]  ;;  %v896_v7 = vld [vmem:[#allocation10 + $0x318] sm:$0xff] }
 0x122   :  { %927 = vmatpush.msra.mxu0 %v919_v61  ;;  %949 = vmatpush.msra.mxu1 %v916_v10 }
 0x123   :  { %850 = vmatpush.msrb.mxu2 %v845_v59 }
 0x124   :  { %928 = vmatpush.msra.mxu0 %v917_v1  ;;  %950 = vmatpush.msra.mxu1 %v914_v15  ;;  %v823_v15 = vld [vmem:[#allocation10 + $0x230] sm:$0xff] }
 0x125   :  { %851 = vmatpush.msrb.mxu2 %v843_v17 }
 0x126   :  { %929 = vmatpush.msra.mxu0 %v915_v9  ;;  %951 = vmatpush.msra.mxu1 %v912_v21  ;;  %v826_v9 = vld [vmem:[#allocation10 + $0x248] sm:$0xff] }
 0x127   :  { %852 = vmatpush.msrb.mxu2 %v841_v23  ;;  %v820_v23 = vld [vmem:[#allocation10 + $0x218] sm:$0xff] }
 0x128   :  { %930 = vmatpush.msra.mxu0 %v913_v12  ;;  %952 = vmatpush.msra.mxu1 %v910_v14  ;;  %v894_v12 = vld [vmem:[#allocation10 + $0x308] sm:$0xff] }
 0x129   :  { %853 = vmatpush.msrb.mxu2 %v839_v26  ;;  %v818_v14 = vld [vmem:[#allocation10 + $0x208] sm:$0xff] }
 0x12a   :  { %931 = vmatpush.msra.mxu0 %v911_v19  ;;  %953 = vmatpush.msra.mxu1 %v908_v31  ;;  %v822_v19 = vld [vmem:[#allocation10 + $0x228] sm:$0xff] }
 0x12b   :  { %854 = vmatpush.msrb.mxu2 %v837_v35 }
 0x12c   :  { %932 = vmatpush.msra.mxu0 %v909_v25  ;;  %954 = vmatpush.msra.mxu1 %v906_v39  ;;  %v817_v25 = vld [vmem:[#allocation10 + $0x200] sm:$0xff] }
 0x12d   :  { %855 = vmatpush.msrb.mxu2 %v835_v40 }
 0x12e   :  { %933 = vmatpush.msra.mxu0 %v907_v28  ;;  %955 = vmatpush.msra.mxu1 %v904_v44  ;;  %v1137_v28 = vld [vmem:[%s1562_s6] ss:$0 sm:$0xff]  ;;  %v1007_v44 = vld [vmem:[%s1565_s9 + $0xf0] sm:$0xff] }
 0x12f   :  { %856 = vmatpush.msrb.mxu2 %v833_v46  ;;  %v990_v46 = vld [vmem:[%s1565_s9 + $0x68] sm:$0xff] }
 0x130   :  { %934 = vmatpush.msra.mxu0 %v905_v37  ;;  %956 = vmatpush.msra.mxu1 %v902_v51  ;;  %v1004_v51 = vld [vmem:[%s1565_s9 + $0xd8] sm:$0xff] }
 0x131   :  { %857 = vmatpush.msrb.mxu2 %v831_v52  ;;  %v1003_v52 = vld [vmem:[%s1565_s9 + $0xd0] sm:$0xff] }
 0x132   :  { %935 = vmatpush.msra.mxu0 %v903_v43  ;;  %957 = vmatpush.msra.mxu1 %v900_v56  ;;  %v991_v43 = vld [vmem:[%s1565_s9 + $0x70] sm:$0xff]  ;;  %v1001_v56 = vld [vmem:[%s1565_s9 + $0xc0] sm:$0xff] }
 0x134   :  { %936 = vmatpush.msra.mxu0 %v901_v50  ;;  %958 = vmatpush.msra.mxu1 %v898_v63  ;;  %v988_v50 = vld [vmem:[%s1565_s9 + $0x58] sm:$0xff]  ;;  %v998_v63 = vld [vmem:[%s1565_s9 + $0xa8] sm:$0xff] }
 0x136   :  { %937 = vmatpush.msra.mxu0 %v899_v55  ;;  %959 = vmatpush.msra.mxu1 %v896_v7  ;;  %v985_v55 = vld [vmem:[%s1565_s9 + $0x40] sm:$0xff]  ;;  %v994_v7 = vld [vmem:[%s1565_s9 + $0x88] sm:$0xff] }
 0x138   :  { %938 = vmatpush.msra.mxu0 %v897_v62  ;;  %960 = vmatpush.msra.mxu1 %v894_v12  ;;  %v982_v62 = vld [vmem:[%s1565_s9 + $0x28] sm:$0xff] }
 0x16b   :  { %v480_v6 = vpop.f32.mrf.mxu2 }
 0x173   :  { %v483_v32 = vpop.f32.mrf.mxu2 }
 0x175   :  { %v1400_v41 = vpop.f32.mrf.mxu1 }
 0x176   :  { %v481_v16 = vadd.f32 %v480_v6, %v1400_v41  ;;  %v836_v41 = vld [vmem:[#allocation10 + $0x298] sm:$0xff]  ;;  %v895_v6 = vld [vmem:[#allocation10 + $0x310] sm:$0xff] }
 0x177   :  { %v575_v20 = vpop.f32.mrf.mxu0  ;;  %875 = vmatpush.msrb.mxu3 %v836_v41  ;;  %939 = vmatpush.msra.mxu0 %v895_v6  ;;  %v978_v6 = vld [vmem:[%s1565_s9 + $0x8] sm:$0xff] }
 0x179   :  { %876 = vmatpush.msrb.mxu3 %v834_v47  ;;  %940 = vmatpush.msra.mxu0 %v893_v11  ;;  %v1006_v47 = vld [vmem:[%s1565_s9 + $0xe8] sm:$0xff] }
 0x17b   :  { %877 = vmatpush.msrb.mxu3 %v832_v53  ;;  %v986_v53 = vld [vmem:[%s1565_s9 + $0x48] sm:$0xff] }
 0x17c   :  { %v526_v3 = vpop.f32.mrf.mxu3 }
 0x17d   :  { %v535_v22 = vadd.f32 %v526_v3, %v481_v16  ;;  %v828_v3 = vld [vmem:[#allocation10 + $0x258] sm:$0xff]  ;;  %878 = vmatpush.msrb.mxu3 %v830_v58  ;;  %v1000_v58 = vld [vmem:[%s1565_s9 + $0xb8] sm:$0xff] }
 0x17e   :  { %v1402_v57 = vpop.f32.mrf.mxu1 }
 0x17f   :  { %v584_v34 = vadd.f32 %v575_v20, %v535_v22  ;;  %v484_v33 = vadd.f32 %v483_v32, %v1402_v57  ;;  %v829_v57 = vld [vmem:[#allocation10 + $0x260] sm:$0xff]  ;;  %879 = vmatpush.msrb.mxu3 %v828_v3  ;;  %v819_v22 = vld [vmem:[#allocation10 + $0x210] sm:$0xff]  ;;  %v996_v3 = vld [vmem:[%s1565_s9 + $0x98] sm:$0xff] }
 0x180   :  { %858 = vmatpush.msrb.mxu2 %v829_v57  ;;  %v984_v57 = vld [vmem:[%s1565_s9 + $0x38] sm:$0xff] }
 0x181   :  { %v578_v45 = vpop.f32.mrf.mxu0  ;;  %880 = vmatpush.msrb.mxu3 %v826_v9  ;;  %v993_v9 = vld [vmem:[%s1565_s9 + $0x80] sm:$0xff] }
 0x182   :  { %859 = vmatpush.msrb.mxu2 %v827_v2  ;;  %v980_v2 = vld [vmem:[%s1565_s9 + $0x18] sm:$0xff] }
 0x184   :  { %860 = vmatpush.msrb.mxu2 %v825_v8  ;;  %v977_v8 = vld [vmem:[%s1565_s9] sm:$0xff] }
 0x185   :  { %v486_v60 = vpop.f32.mrf.mxu2 }
 0x186   :  { %v1404_v13 = vpop.f32.mrf.mxu1  ;;  %v529_v29 = vpop.f32.mrf.mxu3  ;;  %861 = vmatpush.msrb.mxu2 %v823_v15 }
 0x187   :  { %v536_v48 = vadd.f32 %v529_v29, %v484_v33  ;;  %v487_v4 = vadd.f32 %v486_v60, %v1404_v13  ;;  %v824_v13 = vld [vmem:[#allocation10 + $0x238] sm:$0xff]  ;;  %v992_v33 = vld [vmem:[%s1565_s9 + $0x78] sm:$0xff]  ;;  %v983_v60 = vld [vmem:[%s1565_s9 + $0x30] sm:$0xff] }
 0x188   :  { %881 = vmatpush.msrb.mxu3 %v824_v13  ;;  %862 = vmatpush.msrb.mxu2 %v821_v18  ;;  %v967_v13 = vld [vmem:[%s1564_s8] sm:$0x3] }
 0x189   :  { %v585_v61 = vadd.f32 %v578_v45, %v536_v48  ;;  %v581_v17 = vpop.f32.mrf.mxu0  ;;  %v989_v48 = vld [vmem:[%s1565_s9 + $0x60] sm:$0xff]  ;;  %v987_v45 = vld [vmem:[%s1565_s9 + $0x50] sm:$0xff] }
 0x18a   :  { %882 = vmatpush.msrb.mxu3 %v822_v19  ;;  %863 = vmatpush.msrb.mxu2 %v819_v22 }
 0x18c   :  { %883 = vmatpush.msrb.mxu3 %v820_v23  ;;  %864 = vmatpush.msrb.mxu2 %v817_v25  ;;  %v970_v23 = vperm.slane %v967_v13, 1 }
 0x18e   :  { %v624_v38 = vpop.f32.mrf.mxu1  ;;  %v532_v0 = vpop.f32.mrf.mxu3  ;;  %884 = vmatpush.msrb.mxu3 %v818_v14 }
 0x18f   :  { %v633_v42 = vadd.f32 %v624_v38, %v584_v34  ;;  %v537_v10 = vadd.f32 %v532_v0, %v487_v4  ;;  %v981_v0 = vld [vmem:[%s1565_s9 + $0x20] sm:$0xff]  ;;  %v979_v4 = vld [vmem:[%s1565_s9 + $0x10] sm:$0xff] }
 0x191   :  { %v1414_v49 = vadd.f32 %v1410_v30, %v633_v42  ;;  %v586_v20 = vadd.f32 %v581_v17, %v537_v10  ;;  %v1008_v42 = vld [vmem:[%s1565_s9 + $0xf8] sm:$0xff] }
 0x192   :  { %v1057_v10 = vld [vmem:[%s1567_s11 + $0x18] sm:$0xff] }
 0x193   :  { %v643_v54 = vmax.f32 %v1414_v49, 0.0  ;;  %v1005_v49 = vld [vmem:[%s1565_s9 + $0xe0] sm:$0xff] }
 0x195   :  { %646 = vst [vmem:[#allocation4] sm:$0xff] %v643_v54 }
 0x196   :  { %v627_v1 = vpop.f32.mrf.mxu1 }
 0x197   :  { %v634_v5 = vadd.f32 %v627_v1, %v585_v61  ;;  %v999_v61 = vld [vmem:[%s1565_s9 + $0xb0] sm:$0xff]  ;;  %v997_v1 = vld [vmem:[%s1565_s9 + $0xa0] sm:$0xff] }
 0x199   :  { %v641_v59 = vadd.f32 %v1410_v30, %v634_v5  ;;  %v995_v5 = vld [vmem:[%s1565_s9 + $0x90] sm:$0xff] }
 0x19b   :  { %v644_v16 = vmax.f32 %v641_v59, 0.0 }
 0x19d   :  { %647 = vst [vmem:[#allocation4 + $0x8] sm:$0xff] %v644_v16 }
 0x19e   :  { %v630_v21 = vpop.f32.mrf.mxu1 }
 0x19f   :  { %v635_v24 = vadd.f32 %v630_v21, %v586_v20  ;;  %v969_v21 = vperm.slane %v967_v13, 0 }
 0x1a1   :  { %v642_v26 = vadd.f32 %v1410_v30, %v635_v24 }
 0x1a3   :  { %v645_v27 = vmax.f32 %v642_v26, 0.0 }
 0x1a4   :  { %v652_v29 = vld [vmem:[#allocation4 + $0x2] sm:$0xff] }
 0x1a5   :  { %v655_v31 = vmax.f32 %v643_v54, %v652_v29  ;;  %648 = vst [vmem:[#allocation4 + $0x10] sm:$0x3f] %v645_v27  ;;  %v1002_v54 = vld [vmem:[%s1565_s9 + $0xc8] sm:$0xff] }
 0x1a7   :  { %v662_v32 = vadd.f32 %v1137_v28, %v655_v31 }
 0x1a9   :  { %665 = vst [vmem:[#allocation5] sm:$0xff] %v662_v32  ;;  %791 = vmatmul.f32.vlgmr.msrb.gmra.mxu0 %v662_v32  ;;  %811 = vmatmul.f32.vlgmr.msrb.gmra.mxu1 %v662_v32  ;;  %v1056_v32 = vld [vmem:[%s1567_s11 + $0x10] sm:$0xff] }
 0x1aa   :  { %1078 = vmatpush.msrb.mxu0 %v1057_v10 }
 0x1ac   :  { %v651_v34 = vld [vmem:[#allocation4 + $0x10] sm:$0xf]  ;;  %1079 = vmatpush.msrb.mxu0 %v1056_v32 }
 0x1ad   :  { %v653_v30 = vld [vmem:[#allocation4 + $0xa] sm:$0xff]  ;;  %v654_v35 = vld [vmem:[#allocation4 + $0x12] sm:$0xf] }
 0x1ae   :  { %v656_v36 = vmax.f32 %v644_v16, %v653_v30  ;;  %v657_v37 = vmax.f32 %v651_v34, %v654_v35  ;;  %v1055_v34 = vld [vmem:[%s1567_s11 + $0x8] sm:$0xff]  ;;  %v1054_v30 = vld [vmem:[%s1567_s11] sm:$0xff] }
 0x1af   :  { %1080 = vmatpush.msrb.mxu0 %v1055_v34  ;;  %v1088_v35 = vld [vmem:[%s1569_s13 + $0x8] sm:$0xff] }
 0x1b0   :  { %v663_v38 = vadd.f32 %v1137_v28, %v656_v36  ;;  %v664_v39 = vadd.f32 %v1137_v28, %v657_v37  ;;  %1111 = vmatpush.msrb.mxu1 %v1088_v35  ;;  %v1138_v36 = vld [vmem:[%s1566_s10] ss:$0 sm:$0xff] }
 0x1b1   :  { %1081 = vmatpush.msrb.mxu0 %v1054_v30 }
 0x1b2   :  { %666 = vst [vmem:[#allocation5 + $0x8] sm:$0xff] %v663_v38 }
 0x1b3   :  { %667 = vst [vmem:[#allocation5 + $0x10] sm:$0xf] %v664_v39 }
 0x1b9   :  { %v701_v40 = vld [vmem:[#allocation5 + $0x4] sm:$0xff] }
 0x1ba   :  { %751 = vmatmul.f32.vlgmr.msra.gmra.mxu2 %v701_v40  ;;  %771 = vmatmul.f32.vlgmr.msra.gmra.mxu3 %v701_v40  ;;  %v891_v41 = vld [vmem:[#allocation5 + $0xc] sm:$0xff] }
 0x1bb   :  { %941 = vmatmul.f32.vlgmr.msra.gmra.mxu0 %v891_v41  ;;  %961 = vmatmul.f32.vlgmr.msra.gmra.mxu1 %v891_v41 }
 0x1bc   :  { %1013 = vmatpush.msra.mxu2 %v992_v33  ;;  %1033 = vmatpush.msra.mxu3 %v1008_v42  ;;  %v1087_v33 = vld [vmem:[%s1569_s13] sm:$0xff] }
 0x1bd   :  { %1112 = vmatpush.msrb.mxu1 %v1087_v33  ;;  %v1139_v42 = vld [vmem:[%s1568_s12] ss:$0 sm:$0xff] }
 0x1be   :  { %1014 = vmatpush.msra.mxu2 %v991_v43  ;;  %1034 = vmatpush.msra.mxu3 %v1007_v44 }
 0x1c0   :  { %1015 = vmatpush.msra.mxu2 %v990_v46  ;;  %1035 = vmatpush.msra.mxu3 %v1006_v47  ;;  %v1140_v47 = vld [vmem:[%s1570_s14] ss:$0 sm:$0xff] }
 0x1c2   :  { %865 = vmatmul.f32.vlgmr.msrb.gmra.mxu2 %v663_v38  ;;  %885 = vmatmul.f32.vlgmr.msrb.gmra.mxu3 %v663_v38 }
 0x1c3   :  { %1016 = vmatpush.msra.mxu2 %v989_v48  ;;  %1036 = vmatpush.msra.mxu3 %v1005_v49 }
 0x1c5   :  { %1017 = vmatpush.msra.mxu2 %v988_v50  ;;  %1037 = vmatpush.msra.mxu3 %v1004_v51 }
 0x1c7   :  { %1018 = vmatpush.msra.mxu2 %v987_v45  ;;  %1038 = vmatpush.msra.mxu3 %v1003_v52 }
 0x1c9   :  { %1019 = vmatpush.msra.mxu2 %v986_v53  ;;  %1039 = vmatpush.msra.mxu3 %v1002_v54 }
 0x1cb   :  { %1020 = vmatpush.msra.mxu2 %v985_v55  ;;  %1040 = vmatpush.msra.mxu3 %v1001_v56 }
 0x1cd   :  { %1021 = vmatpush.msra.mxu2 %v984_v57  ;;  %1041 = vmatpush.msra.mxu3 %v1000_v58 }
 0x1cf   :  { %1022 = vmatpush.msra.mxu2 %v983_v60  ;;  %1042 = vmatpush.msra.mxu3 %v999_v61 }
 0x1d1   :  { %1023 = vmatpush.msra.mxu2 %v982_v62  ;;  %1043 = vmatpush.msra.mxu3 %v998_v63 }
 0x1d3   :  { %1024 = vmatpush.msra.mxu2 %v981_v0  ;;  %1044 = vmatpush.msra.mxu3 %v997_v1 }
 0x1d5   :  { %1025 = vmatpush.msra.mxu2 %v980_v2  ;;  %1045 = vmatpush.msra.mxu3 %v996_v3 }
 0x1d7   :  { %1026 = vmatpush.msra.mxu2 %v979_v4  ;;  %1046 = vmatpush.msra.mxu3 %v995_v5 }
 0x1d9   :  { %1027 = vmatpush.msra.mxu2 %v978_v6  ;;  %1047 = vmatpush.msra.mxu3 %v994_v7 }
 0x1db   :  { %1028 = vmatpush.msra.mxu2 %v977_v8  ;;  %1048 = vmatpush.msra.mxu3 %v993_v9 }
 0x226   :  { %v792_v12 = vpop.f32.mrf.mxu0  ;;  %v812_v15 = vpop.f32.mrf.mxu1 }
 0x238   :  { %v942_v24 = vpop.f32.mrf.mxu0  ;;  %v962_v25 = vpop.f32.mrf.mxu1 }
 0x23d   :  { %v752_v59 = vpop.f32.mrf.mxu2  ;;  %v772_v11 = vpop.f32.mrf.mxu3 }
 0x23e   :  { %v793_v16 = vadd.f32 %v792_v12, %v752_v59  ;;  %v813_v17 = vadd.f32 %v812_v15, %v772_v11 }
 0x245   :  { %v866_v18 = vpop.f32.mrf.mxu2  ;;  %v886_v19 = vpop.f32.mrf.mxu3 }
 0x246   :  { %v889_v20 = vadd.f32 %v866_v18, %v793_v16  ;;  %v890_v22 = vadd.f32 %v886_v19, %v813_v17 }
 0x248   :  { %v965_v14 = vadd.f32 %v942_v24, %v889_v20  ;;  %v966_v26 = vadd.f32 %v962_v25, %v890_v22 }
 0x24a   :  { %v973_v27 = vadd.f32 %v969_v21, %v965_v14  ;;  %v974_v28 = vadd.f32 %v970_v23, %v966_v26 }
 0x24c   :  { %v975_v29 = vmax.f32 %v973_v27, 0.0  ;;  %v976_v31 = vmax.f32 %v974_v28, 0.0 }
 0x24e   :  { %1029 = vmatmul.f32.vlgmr.msra.gmra.mxu2 %v975_v29  ;;  %1049 = vmatmul.f32.vlgmr.msra.gmra.mxu3 %v976_v31 }
 0x2d1   :  { %v1030_v37 = vpop.f32.mrf.mxu2  ;;  %v1050_v39 = vpop.f32.mrf.mxu3 }
 0x2d2   :  { %v1031_v38 = vadd.f32 %v1138_v36, %v1030_v37 }
 0x2d4   :  { %v1051_v40 = vadd.f32 %v1050_v39, %v1031_v38 }
 0x2d6   :  { %v1053_v41 = vmax.f32 %v1051_v40, 0.0 }
 0x2d8   :  { %1125 = vmatmul.msk.f32.vlgmr.msrb.gmra.mxu0 %vm1062_vm0, %v1053_v41 }
 0x355   :  { %v1083_v43 = vpop.f32.mrf.mxu0 }
 0x356   :  { %v1084_v44 = vadd.f32 %v1139_v42, %v1083_v43 }
 0x358   :  { %v1086_v46 = vmax.f32 %v1084_v44, 0.0 }
 0x35a   :  { %1126 = vmatmul.msk.f32.vlgmr.msrb.gmra.mxu1 %vm1093_vm1, %v1086_v46 }
 0x3d7   :  { %v1114_v48 = vpop.f32.mrf.mxu1 }
 0x3d8   :  { %v1115_v49 = vadd.f32 %v1140_v47, %v1114_v48 }
 0x3da   :  { %1118 = vst.msk [vmem:[%s1571_s15] sm:$0xff] %vm1117_vm2, %v1115_v49 }
 0x3db   :  { %1123 = vsyncpa [#allocation7], 1 }
 0x3dc   :  { %1124 = vsyncpa [#allocation9], 1 }

</bundles_post_ra>
